<compile_context>
chip_gen: v7x
topology: tpu7x:2x2x1
jax: 0.10.0
libtpu: 0.0.40
codegen_flags: <defaults>
</compile_context>

<pallas_src>
import jax
import jax.numpy as jnp
from jax import lax
from jax.experimental import pallas as pl
from jax.experimental.pallas import tpu as pltpu

EPS = 1e-5          # torch.nn.BatchNorm1d default eps
H1 = 128            # padded width of Linear(shape, 100) / BatchNorm1d(100)
H2 = 128            # padded width of Linear(100, 50)  / BatchNorm1d(50)
H1_REAL = 100
H2_REAL = 50


# --------------------------------------------------------------------------
# Host-side helpers
# --------------------------------------------------------------------------
def _choose_tiling(batch, feat):
    """Pick (padded batch, batch tile).

    Tiles are (8,128)-friendly multiples of 256.  The x tile is capped at
    ~8 MiB so double-buffered inputs + f32 intermediates stay far below the
    48 MiB scoped-VMEM budget (itself below v7x's 64 MiB physical VMEM).
    """
    budget = 8 * 1024 * 1024
    cands = [tb for tb in (2048, 1024, 512, 256) if tb * feat * 4 <= budget]
    if not cands:
        cands = [256]
    b_pad = ((batch + 255) // 256) * 256
    tb = next(t for t in cands if b_pad % t == 0)
    return b_pad, tb


def mlp_forward(x, p):
    """x: (B, F) float32.  p: packed (padded) parameter dict from pack_params."""
    x = jnp.asarray(x, jnp.float32)
    B, F = x.shape
    B_pad, TB = _choose_tiling(B, F)
    nbt = B_pad // TB
    if B_pad != B:
        x = jnp.pad(x, ((0, B_pad - B), (0, 0)))   # zero rows, masked in stats
    inv_b = 1.0 / float(B)                          # n = REAL batch size

    def kernel(x_ref, w1_ref, w2_ref, bn1_ref, bn2w3_ref, b3_ref, o_ref,
               p1a, p1b, p2a, p2b):
        ph = pl.program_id(0)          # 0: BN1 stats, 1: BN2 stats, 2: forward
        i = pl.program_id(1)           # batch tile
        last = pl.num_programs(1) - 1

        # Valid-row mask (1, TB): 0 for zero-padded batch rows.  Folding it
        # into the ones-row reduction matmul puts masking + axis-0 reduction
        # on the MXU (which has slack here) instead of the VPU/XLU.
        lane = lax.broadcasted_iota(jnp.int32, (1, TB), 1)
        mask_row = ((i * TB + lane) < B).astype(jnp.float32)

        # h1 = x @ W1 is needed in every phase (b1/b2 dropped: exactly
        # cancelled by the training-mode batch-mean subtraction).
        h1 = jnp.dot(x_ref[...], w1_ref[...], preferred_element_type=jnp.float32)

        def fold(s_ref, ss_ref, gb_ref):
            # Convert accumulated [sum, sumsq] into BN scale/shift (a, c),
            # stored back in place:  y = h*a + c.
            mu = s_ref[...] * inv_b
            var = jnp.maximum(ss_ref[...] * inv_b - mu * mu, 0.0)
            a = gb_ref[0:1, :] * lax.rsqrt(var + EPS)
            c = gb_ref[1:2, :] - mu * a
            s_ref[...] = a
            ss_ref[...] = c

        # ---- phase 0: batch sum / sum-of-squares of h1 ---------------------
        @pl.when(ph == 0)
        def _():
            @pl.when(i == 0)
            def _():
                p1a[...] = jnp.zeros_like(p1a)
                p1b[...] = jnp.zeros_like(p1b)
            p1a[...] += jnp.dot(mask_row, h1, preferred_element_type=jnp.float32)
            p1b[...] += jnp.dot(mask_row, h1 * h1,
                                preferred_element_type=jnp.float32)

            @pl.when(i == last)
            def _():
                fold(p1a, p1b, bn1_ref)
            o_ref[...] = jnp.zeros_like(o_ref)   # real values written in phase 2

        # ---- phase 1: batch sum / sum-of-squares of h2 ---------------------
        @pl.when(ph == 1)
        def _():
            @pl.when(i == 0)
            def _():
                p2a[...] = jnp.zeros_like(p2a)
                p2b[...] = jnp.zeros_like(p2b)
            y1 = jnp.maximum(h1 * p1a[...] + p1b[...], 0.0)   # folded BN1+ReLU
            h2 = jnp.dot(y1, w2_ref[...], preferred_element_type=jnp.float32)
            p2a[...] += jnp.dot(mask_row, h2, preferred_element_type=jnp.float32)
            p2b[...] += jnp.dot(mask_row, h2 * h2,
                                preferred_element_type=jnp.float32)

            @pl.when(i == last)
            def _():
                fold(p2a, p2b, bn2w3_ref)
            o_ref[...] = jnp.zeros_like(o_ref)

        # ---- phase 2: full normalized forward, lane-dense (1, TB) output ---
        @pl.when(ph == 2)
        def _():
            y1 = jnp.maximum(h1 * p1a[...] + p1b[...], 0.0)   # folded BN1+ReLU
            h2 = jnp.dot(y1, w2_ref[...], preferred_element_type=jnp.float32)
            y2 = jnp.maximum(h2 * p2a[...] + p2b[...], 0.0)   # folded BN2+ReLU
            # Final Linear(50->1) computed transposed: contract the feature
            # axis of w3 (row 2 of the bn2w3 slab) against y2 -> (1, TB) with
            # the batch on the lane axis (lane-dense output store).
            z = lax.dot_general(bn2w3_ref[2:3, :], y2,
                                dimension_numbers=(((1,), (1,)), ((), ())),
                                preferred_element_type=jnp.float32)
            z = z + b3_ref[...]                   # (1,1) broadcast over lanes
            o_ref[...] = 1.0 / (1.0 + jnp.exp(-z))   # exp rides the EUP

    in_specs = [
        pl.BlockSpec((TB, F), lambda ph, i: (i, 0)),     # x tile (pipelined)
        pl.BlockSpec((F, H1), lambda ph, i: (0, 0)),     # W1 (resident)
        pl.BlockSpec((H1, H2), lambda ph, i: (0, 0)),    # W2 (resident)
        pl.BlockSpec((2, H1), lambda ph, i: (0, 0)),     # [gamma1; beta1]
        pl.BlockSpec((3, H2), lambda ph, i: (0, 0)),     # [gamma2; beta2; w3]
        pl.BlockSpec((1, 1), lambda ph, i: (0, 0)),      # b3
    ]
    out_specs = pl.BlockSpec((1, TB), lambda ph, i: (0, i))

    cost = pl.CostEstimate(
        flops=int(B_pad * (6 * F * H1 + 4 * H1 * H2 + 10 * H1 + 12 * H2 + 4)),
        transcendentals=B_pad + 2 * (H1 + H2),
        bytes_accessed=4 * (3 * B_pad * F + F * H1 + H1 * H2 + 2 * H1
                            + 3 * H2 + 1 + 3 * B_pad),
    )

    out = pl.pallas_call(
        kernel,
        grid=(3, nbt),
        in_specs=in_specs,
        out_specs=out_specs,
        out_shape=jax.ShapeDtypeStruct((1, B_pad), jnp.float32),
        scratch_shapes=[pltpu.VMEM((1, H1), jnp.float32),   # s1 -> a1
                        pltpu.VMEM((1, H1), jnp.float32),   # ss1 -> c1
                        pltpu.VMEM((1, H2), jnp.float32),   # s2 -> a2
                        pltpu.VMEM((1, H2), jnp.float32)],  # ss2 -> c2
        compiler_params=pltpu.CompilerParams(
            # Both axes "arbitrary": the shared stats scratch requires a
            # sequential batch axis (v7x megacore traded for 1-launch fusion).
            dimension_semantics=("arbitrary", "arbitrary"),
            vmem_limit_bytes=48 * 1024 * 1024,
        ),
        cost_estimate=cost,
    )(x, p["w1"], p["w2"], p["bn1"], p["bn2w3"], p["b3"])

    return out[:, :B].reshape(B, 1)


# --------------------------------------------------------------------------
# Parameters
# --------------------------------------------------------------------------
def init_params(key, in_features):
    """PyTorch-Linear-style uniform init (unpadded, torch layout w/ biases)."""
    dims = [(in_features, H1_REAL), (H1_REAL, H2_REAL), (H2_REAL, 1)]
    params = {}
    keys = jax.random.split(key, 2 * len(dims))
    for i, (fin, fout) in enumerate(dims):
        bound = 1.0 / (float(fin) ** 0.5)
        params[f"w{i + 1}"] = jax.random.uniform(
            keys[2 * i], (fin, fout), jnp.float32, -bound, bound)
        params[f"b{i + 1}"] = jax.random.uniform(
            keys[2 * i + 1], (1, fout), jnp.float32, -bound, bound)
    params["g1"] = jnp.ones((1, H1_REAL), jnp.float32)
    params["be1"] = jnp.zeros((1, H1_REAL), jnp.float32)
    params["g2"] = jnp.ones((1, H2_REAL), jnp.float32)
    params["be2"] = jnp.zeros((1, H2_REAL), jnp.float32)
    return params


def pack_params(p):
    """Pad hidden widths to 128, drop BN-cancelled biases b1/b2, stack slabs.

    Padded weight columns and padded gamma/beta are exactly zero, so padded
    features are 0 after BN+ReLU and contribute nothing downstream.
    """
    f_in = p["w1"].shape[0]
    w1 = jnp.zeros((f_in, H1), jnp.float32).at[:, :H1_REAL].set(p["w1"])
    w2 = jnp.zeros((H1, H2), jnp.float32).at[:H1_REAL, :H2_REAL].set(p["w2"])
    bn1 = (jnp.zeros((2, H1), jnp.float32)
           .at[0, :H1_REAL].set(p["g1"][0])
           .at[1, :H1_REAL].set(p["be1"][0]))
    bn2w3 = (jnp.zeros((3, H2), jnp.float32)
             .at[0, :H2_REAL].set(p["g2"][0])
             .at[1, :H2_REAL].set(p["be2"][0])
             .at[2, :H2_REAL].set(p["w3"][:, 0]))
    b3 = p["b3"].reshape(1, 1).astype(jnp.float32)
    return dict(w1=w1, w2=w2, bn1=bn1, bn2w3=bn2w3, b3=b3)


# --------------------------------------------------------------------------
# Pure-JAX reference (torch semantics: biases + training-mode BatchNorm1d)
# --------------------------------------------------------------------------
def reference_forward(x, p):
    def bn(h, g, b):
        mu = jnp.mean(h, axis=0, keepdims=True)
        var = jnp.mean((h - mu) ** 2, axis=0, keepdims=True)
        return (h - mu) / jnp.sqrt(var + EPS) * g + b

    h = jnp.maximum(bn(x @ p["w1"] + p["b1"], p["g1"], p["be1"]), 0.0)
    h = jnp.maximum(bn(h @ p["w2"] + p["b2"], p["g2"], p["be2"]), 0.0)
    return jax.nn.sigmoid(h @ p["w3"] + p["b3"])


if __name__ == "__main__":
    key = jax.random.PRNGKey(0)
    k_x, k_p = jax.random.split(key)

    # "shape" arg of MLP == number of input features.  B=600 exercises the
    # batch grid (three 256-row tiles), batch padding (600 -> 768 rows) and
    # the in-kernel masked BN statistics, while staying small.
    B, F = 600, 16
    x = jax.random.normal(k_x, (B, F), jnp.float32)
    torch_params = init_params(k_p, F)
    kernel_params = pack_params(torch_params)

    out = jax.block_until_ready(jax.jit(mlp_forward)(x, kernel_params))
    ref = jax.block_until_ready(reference_forward(x, torch_params))

    assert out.shape == (B, 1)
    max_err = float(jnp.max(jnp.abs(out - ref)))
    assert jnp.allclose(out, ref, atol=1e-4, rtol=1e-4), f"mismatch: {max_err}"

    print("KERNEL_OK")
</pallas_src>

<mosaic_0001>
module attributes {stable_mosaic.version = 11 : i64} {
  func.func @kernel(%arg0: i32, %arg1: i32, %arg2: memref<256x16xf32, #tpu.memory_space<vmem>>, %arg3: memref<16x128xf32, #tpu.memory_space<vmem>>, %arg4: memref<128x128xf32, #tpu.memory_space<vmem>>, %arg5: memref<2x128xf32, #tpu.memory_space<vmem>>, %arg6: memref<3x128xf32, #tpu.memory_space<vmem>>, %arg7: memref<1x1xf32, #tpu.memory_space<vmem>>, %arg8: memref<1x256xf32, #tpu.memory_space<vmem>>, %arg9: memref<1x128xf32, #tpu.memory_space<vmem>>, %arg10: memref<1x128xf32, #tpu.memory_space<vmem>>, %arg11: memref<1x128xf32, #tpu.memory_space<vmem>>, %arg12: memref<1x128xf32, #tpu.memory_space<vmem>>) attributes {dimension_semantics = [#tpu.dimension_semantics<arbitrary>, #tpu.dimension_semantics<arbitrary>], iteration_bounds = array<i64: 3, 3>, scalar_prefetch = 0 : i64, scratch_operands = 4 : i64, tpu.core_type = #tpu.core_type<tc>, window_params = [{transform_indices = @transform_0, window_bounds = array<i64: 256, 16>}, {pipeline_mode = #tpu.pipeline_mode<synchronous>, transform_indices = @transform_1, window_bounds = array<i64: 16, 128>}, {pipeline_mode = #tpu.pipeline_mode<synchronous>, transform_indices = @transform_2, window_bounds = array<i64: 128, 128>}, {pipeline_mode = #tpu.pipeline_mode<synchronous>, transform_indices = @transform_3, window_bounds = array<i64: 2, 128>}, {pipeline_mode = #tpu.pipeline_mode<synchronous>, transform_indices = @transform_4, window_bounds = array<i64: 3, 128>}, {pipeline_mode = #tpu.pipeline_mode<synchronous>, transform_indices = @transform_5, window_bounds = array<i64: 1, 1>}, {transform_indices = @transform_6, window_bounds = array<i64: 1, 256>}]} {
    %0 = tpu.iota {dimensions = array<i32: 1>} : vector<1x256xi32>
    %c256_i32 = arith.constant 256 : i32
    %1 = arith.muli %arg1, %c256_i32 : i32
    %2 = vector.broadcast %1 : i32 to vector<1x256xi32>
    %3 = arith.addi %2, %0 : vector<1x256xi32>
    %c600_i32 = arith.constant 600 : i32
    %4 = vector.broadcast %c600_i32 : i32 to vector<1x256xi32>
    %5 = arith.cmpi slt, %3, %4 : vector<1x256xi32>
    %6 = arith.extui %5 : vector<1x256xi1> to vector<1x256xi32>
    %7 = arith.sitofp %6 : vector<1x256xi32> to vector<1x256xf32>
    %c0 = arith.constant 0 : index
    %c0_0 = arith.constant 0 : index
    %8 = vector.load %arg2[%c0, %c0_0] : memref<256x16xf32, #tpu.memory_space<vmem>>, vector<256x16xf32>
    %c0_1 = arith.constant 0 : index
    %c0_2 = arith.constant 0 : index
    %9 = vector.load %arg3[%c0_1, %c0_2] : memref<16x128xf32, #tpu.memory_space<vmem>>, vector<16x128xf32>
    %cst = arith.constant dense<0.000000e+00> : vector<256x128xf32>
    %10 = tpu.matmul %8, %9, %cst {dimension_numbers = #tpu.dot_dimension_numbers<[1], [0], [0], [1], [0, 0, 1, 1], [], []>} : vector<256x16xf32>, vector<16x128xf32>, vector<256x128xf32> -> vector<256x128xf32>
    %c0_i32 = arith.constant 0 : i32
    %11 = arith.cmpi eq, %arg0, %c0_i32 : i32
    %12 = arith.extui %11 : i1 to i32
    %c0_i32_3 = arith.constant 0 : i32
    %13 = arith.cmpi ne, %12, %c0_i32_3 : i32
    scf.if %13 {
      %c0_i32_6 = arith.constant 0 : i32
      %20 = arith.cmpi eq, %arg1, %c0_i32_6 : i32
      %21 = arith.extui %20 : i1 to i32
      %c0_i32_7 = arith.constant 0 : i32
      %22 = arith.cmpi ne, %21, %c0_i32_7 : i32
      scf.if %22 {
        %cst_23 = arith.constant 0.000000e+00 : f32
        %37 = vector.broadcast %cst_23 : f32 to vector<1x128xf32>
        %c0_24 = arith.constant 0 : index
        %c0_25 = arith.constant 0 : index
        %38 = vector.load %arg9[%c0_24, %c0_25] : memref<1x128xf32, #tpu.memory_space<vmem>>, vector<1x128xf32>
        tpu.vector_store %arg9[%c0_24, %c0_25], %37 {strides = array<i32>} : memref<1x128xf32, #tpu.memory_space<vmem>>, vector<1x128xf32>,
        %cst_26 = arith.constant 0.000000e+00 : f32
        %39 = vector.broadcast %cst_26 : f32 to vector<1x128xf32>
        %c0_27 = arith.constant 0 : index
        %c0_28 = arith.constant 0 : index
        %40 = vector.load %arg10[%c0_27, %c0_28] : memref<1x128xf32, #tpu.memory_space<vmem>>, vector<1x128xf32>
        tpu.vector_store %arg10[%c0_27, %c0_28], %39 {strides = array<i32>} : memref<1x128xf32, #tpu.memory_space<vmem>>, vector<1x128xf32>,
      } else {
      }
      %c0_8 = arith.constant 0 : index
      %c0_9 = arith.constant 0 : index
      %23 = vector.load %arg9[%c0_8, %c0_9] : memref<1x128xf32, #tpu.memory_space<vmem>>, vector<1x128xf32>
      %cst_10 = arith.constant dense<0.000000e+00> : vector<1x128xf32>
      %24 = tpu.matmul %7, %10, %cst_10 {dimension_numbers = #tpu.dot_dimension_numbers<[1], [0], [0], [1], [0, 0, 1, 1], [], []>} : vector<1x256xf32>, vector<256x128xf32>, vector<1x128xf32> -> vector<1x128xf32>
      %25 = arith.addf %23, %24 : vector<1x128xf32>
      %c0_11 = arith.constant 0 : index
      %c0_12 = arith.constant 0 : index
      %26 = vector.load %arg9[%c0_11, %c0_12] : memref<1x128xf32, #tpu.memory_space<vmem>>, vector<1x128xf32>
      tpu.vector_store %arg9[%c0_11, %c0_12], %25 {strides = array<i32>} : memref<1x128xf32, #tpu.memory_space<vmem>>, vector<1x128xf32>,
      %c0_13 = arith.constant 0 : index
      %c0_14 = arith.constant 0 : index
      %27 = vector.load %arg10[%c0_13, %c0_14] : memref<1x128xf32, #tpu.memory_space<vmem>>, vector<1x128xf32>
      %28 = arith.mulf %10, %10 : vector<256x128xf32>
      %cst_15 = arith.constant dense<0.000000e+00> : vector<1x128xf32>
      %29 = tpu.matmul %7, %28, %cst_15 {dimension_numbers = #tpu.dot_dimension_numbers<[1], [0], [0], [1], [0, 0, 1, 1], [], []>} : vector<1x256xf32>, vector<256x128xf32>, vector<1x128xf32> -> vector<1x128xf32>
      %30 = arith.addf %27, %29 : vector<1x128xf32>
      %c0_16 = arith.constant 0 : index
      %c0_17 = arith.constant 0 : index
      %31 = vector.load %arg10[%c0_16, %c0_17] : memref<1x128xf32, #tpu.memory_space<vmem>>, vector<1x128xf32>
      tpu.vector_store %arg10[%c0_16, %c0_17], %30 {strides = array<i32>} : memref<1x128xf32, #tpu.memory_space<vmem>>, vector<1x128xf32>,
      %c2_i32_18 = arith.constant 2 : i32
      %32 = arith.cmpi eq, %arg1, %c2_i32_18 : i32
      %33 = arith.extui %32 : i1 to i32
      %c0_i32_19 = arith.constant 0 : i32
      %34 = arith.cmpi ne, %33, %c0_i32_19 : i32
      scf.if %34 {
        %c0_23 = arith.constant 0 : index
        %c0_24 = arith.constant 0 : index
        %37 = vector.load %arg9[%c0_23, %c0_24] : memref<1x128xf32, #tpu.memory_space<vmem>>, vector<1x128xf32>
        %cst_25 = arith.constant 0.00166666671 : f32
        %38 = vector.broadcast %cst_25 : f32 to vector<1x128xf32>
        %39 = arith.mulf %37, %38 : vector<1x128xf32>
        %c0_26 = arith.constant 0 : index
        %c0_27 = arith.constant 0 : index
        %40 = vector.load %arg10[%c0_26, %c0_27] : memref<1x128xf32, #tpu.memory_space<vmem>>, vector<1x128xf32>
        %cst_28 = arith.constant 0.00166666671 : f32
        %41 = vector.broadcast %cst_28 : f32 to vector<1x128xf32>
        %42 = arith.mulf %40, %41 : vector<1x128xf32>
        %43 = arith.mulf %39, %39 : vector<1x128xf32>
        %44 = arith.subf %42, %43 : vector<1x128xf32>
        %cst_29 = arith.constant 0.000000e+00 : f32
        %45 = vector.broadcast %cst_29 : f32 to vector<1x128xf32>
        %46 = arith.maximumf %44, %45 : vector<1x128xf32>
        %c0_30 = arith.constant 0 : index
        %c0_31 = arith.constant 0 : index
        %47 = vector.load %arg5[%c0_30, %c0_31] : memref<2x128xf32, #tpu.memory_space<vmem>>, vector<1x128xf32>
        %cst_32 = arith.constant 9.99999974E-6 : f32
        %48 = vector.broadcast %cst_32 : f32 to vector<1x128xf32>
        %49 = arith.addf %46, %48 : vector<1x128xf32>
        %50 = math.rsqrt %49 : vector<1x128xf32>
        %51 = arith.mulf %47, %50 : vector<1x128xf32>
        %c1 = arith.constant 1 : index
        %c0_33 = arith.constant 0 : index
        %52 = vector.load %arg5[%c1, %c0_33] : memref<2x128xf32, #tpu.memory_space<vmem>>, vector<1x128xf32>
        %53 = arith.mulf %39, %51 : vector<1x128xf32>
        %54 = arith.subf %52, %53 : vector<1x128xf32>
        %c0_34 = arith.constant 0 : index
        %c0_35 = arith.constant 0 : index
        %55 = vector.load %arg9[%c0_34, %c0_35] : memref<1x128xf32, #tpu.memory_space<vmem>>, vector<1x128xf32>
        tpu.vector_store %arg9[%c0_34, %c0_35], %51 {strides = array<i32>} : memref<1x128xf32, #tpu.memory_space<vmem>>, vector<1x128xf32>,
        %c0_36 = arith.constant 0 : index
        %c0_37 = arith.constant 0 : index
        %56 = vector.load %arg10[%c0_36, %c0_37] : memref<1x128xf32, #tpu.memory_space<vmem>>, vector<1x128xf32>
        tpu.vector_store %arg10[%c0_36, %c0_37], %54 {strides = array<i32>} : memref<1x128xf32, #tpu.memory_space<vmem>>, vector<1x128xf32>,
      } else {
      }
      %cst_20 = arith.constant 0.000000e+00 : f32
      %35 = vector.broadcast %cst_20 : f32 to vector<1x256xf32>
      %c0_21 = arith.constant 0 : index
      %c0_22 = arith.constant 0 : index
      %36 = vector.load %arg8[%c0_21, %c0_22] : memref<1x256xf32, #tpu.memory_space<vmem>>, vector<1x256xf32>
      tpu.vector_store %arg8[%c0_21, %c0_22], %35 {strides = array<i32>} : memref<1x256xf32, #tpu.memory_space<vmem>>, vector<1x256xf32>,
    } else {
    }
    %c1_i32 = arith.constant 1 : i32
    %14 = arith.cmpi eq, %arg0, %c1_i32 : i32
    %15 = arith.extui %14 : i1 to i32
    %c0_i32_4 = arith.constant 0 : i32
    %16 = arith.cmpi ne, %15, %c0_i32_4 : i32
    scf.if %16 {
      %c0_i32_6 = arith.constant 0 : i32
      %20 = arith.cmpi eq, %arg1, %c0_i32_6 : i32
      %21 = arith.extui %20 : i1 to i32
      %c0_i32_7 = arith.constant 0 : i32
      %22 = arith.cmpi ne, %21, %c0_i32_7 : i32
      scf.if %22 {
        %cst_31 = arith.constant 0.000000e+00 : f32
        %47 = vector.broadcast %cst_31 : f32 to vector<1x128xf32>
        %c0_32 = arith.constant 0 : index
        %c0_33 = arith.constant 0 : index
        %48 = vector.load %arg11[%c0_32, %c0_33] : memref<1x128xf32, #tpu.memory_space<vmem>>, vector<1x128xf32>
        tpu.vector_store %arg11[%c0_32, %c0_33], %47 {strides = array<i32>} : memref<1x128xf32, #tpu.memory_space<vmem>>, vector<1x128xf32>,
        %cst_34 = arith.constant 0.000000e+00 : f32
        %49 = vector.broadcast %cst_34 : f32 to vector<1x128xf32>
        %c0_35 = arith.constant 0 : index
        %c0_36 = arith.constant 0 : index
        %50 = vector.load %arg12[%c0_35, %c0_36] : memref<1x128xf32, #tpu.memory_space<vmem>>, vector<1x128xf32>
        tpu.vector_store %arg12[%c0_35, %c0_36], %49 {strides = array<i32>} : memref<1x128xf32, #tpu.memory_space<vmem>>, vector<1x128xf32>,
      } else {
      }
      %c0_8 = arith.constant 0 : index
      %c0_9 = arith.constant 0 : index
      %23 = vector.load %arg9[%c0_8, %c0_9] : memref<1x128xf32, #tpu.memory_space<vmem>>, vector<1x128xf32>
      %24 = vector.broadcast %23 : vector<1x128xf32> to vector<256x128xf32>
      %25 = arith.mulf %10, %24 : vector<256x128xf32>
      %c0_10 = arith.constant 0 : index
      %c0_11 = arith.constant 0 : index
      %26 = vector.load %arg10[%c0_10, %c0_11] : memref<1x128xf32, #tpu.memory_space<vmem>>, vector<1x128xf32>
      %27 = vector.broadcast %26 : vector<1x128xf32> to vector<256x128xf32>
      %28 = arith.addf %25, %27 : vector<256x128xf32>
      %cst_12 = arith.constant 0.000000e+00 : f32
      %29 = vector.broadcast %cst_12 : f32 to vector<256x128xf32>
      %30 = arith.maximumf %28, %29 : vector<256x128xf32>
      %c0_13 = arith.constant 0 : index
      %c0_14 = arith.constant 0 : index
      %31 = vector.load %arg4[%c0_13, %c0_14] : memref<128x128xf32, #tpu.memory_space<vmem>>, vector<128x128xf32>
      %cst_15 = arith.constant dense<0.000000e+00> : vector<256x128xf32>
      %32 = tpu.matmul %30, %31, %cst_15 {dimension_numbers = #tpu.dot_dimension_numbers<[1], [0], [0], [1], [0, 0, 1, 1], [], []>} : vector<256x128xf32>, vector<128x128xf32>, vector<256x128xf32> -> vector<256x128xf32>
      %c0_16 = arith.constant 0 : index
      %c0_17 = arith.constant 0 : index
      %33 = vector.load %arg11[%c0_16, %c0_17] : memref<1x128xf32, #tpu.memory_space<vmem>>, vector<1x128xf32>
      %cst_18 = arith.constant dense<0.000000e+00> : vector<1x128xf32>
      %34 = tpu.matmul %7, %32, %cst_18 {dimension_numbers = #tpu.dot_dimension_numbers<[1], [0], [0], [1], [0, 0, 1, 1], [], []>} : vector<1x256xf32>, vector<256x128xf32>, vector<1x128xf32> -> vector<1x128xf32>
      %35 = arith.addf %33, %34 : vector<1x128xf32>
      %c0_19 = arith.constant 0 : index
      %c0_20 = arith.constant 0 : index
      %36 = vector.load %arg11[%c0_19, %c0_20] : memref<1x128xf32, #tpu.memory_space<vmem>>, vector<1x128xf32>
      tpu.vector_store %arg11[%c0_19, %c0_20], %35 {strides = array<i32>} : memref<1x128xf32, #tpu.memory_space<vmem>>, vector<1x128xf32>,
      %c0_21 = arith.constant 0 : index
      %c0_22 = arith.constant 0 : index
      %37 = vector.load %arg12[%c0_21, %c0_22] : memref<1x128xf32, #tpu.memory_space<vmem>>, vector<1x128xf32>
      %38 = arith.mulf %32, %32 : vector<256x128xf32>
      %cst_23 = arith.constant dense<0.000000e+00> : vector<1x128xf32>
      %39 = tpu.matmul %7, %38, %cst_23 {dimension_numbers = #tpu.dot_dimension_numbers<[1], [0], [0], [1], [0, 0, 1, 1], [], []>} : vector<1x256xf32>, vector<256x128xf32>, vector<1x128xf32> -> vector<1x128xf32>
      %40 = arith.addf %37, %39 : vector<1x128xf32>
      %c0_24 = arith.constant 0 : index
      %c0_25 = arith.constant 0 : index
      %41 = vector.load %arg12[%c0_24, %c0_25] : memref<1x128xf32, #tpu.memory_space<vmem>>, vector<1x128xf32>
      tpu.vector_store %arg12[%c0_24, %c0_25], %40 {strides = array<i32>} : memref<1x128xf32, #tpu.memory_space<vmem>>, vector<1x128xf32>,
      %c2_i32_26 = arith.constant 2 : i32
      %42 = arith.cmpi eq, %arg1, %c2_i32_26 : i32
      %43 = arith.extui %42 : i1 to i32
      %c0_i32_27 = arith.constant 0 : i32
      %44 = arith.cmpi ne, %43, %c0_i32_27 : i32
      scf.if %44 {
        %c0_31 = arith.constant 0 : index
        %c0_32 = arith.constant 0 : index
        %47 = vector.load %arg11[%c0_31, %c0_32] : memref<1x128xf32, #tpu.memory_space<vmem>>, vector<1x128xf32>
        %cst_33 = arith.constant 0.00166666671 : f32
        %48 = vector.broadcast %cst_33 : f32 to vector<1x128xf32>
        %49 = arith.mulf %47, %48 : vector<1x128xf32>
        %c0_34 = arith.constant 0 : index
        %c0_35 = arith.constant 0 : index
        %50 = vector.load %arg12[%c0_34, %c0_35] : memref<1x128xf32, #tpu.memory_space<vmem>>, vector<1x128xf32>
        %cst_36 = arith.constant 0.00166666671 : f32
        %51 = vector.broadcast %cst_36 : f32 to vector<1x128xf32>
        %52 = arith.mulf %50, %51 : vector<1x128xf32>
        %53 = arith.mulf %49, %49 : vector<1x128xf32>
        %54 = arith.subf %52, %53 : vector<1x128xf32>
        %cst_37 = arith.constant 0.000000e+00 : f32
        %55 = vector.broadcast %cst_37 : f32 to vector<1x128xf32>
        %56 = arith.maximumf %54, %55 : vector<1x128xf32>
        %c0_38 = arith.constant 0 : index
        %c0_39 = arith.constant 0 : index
        %57 = vector.load %arg6[%c0_38, %c0_39] : memref<3x128xf32, #tpu.memory_space<vmem>>, vector<1x128xf32>
        %cst_40 = arith.constant 9.99999974E-6 : f32
        %58 = vector.broadcast %cst_40 : f32 to vector<1x128xf32>
        %59 = arith.addf %56, %58 : vector<1x128xf32>
        %60 = math.rsqrt %59 : vector<1x128xf32>
        %61 = arith.mulf %57, %60 : vector<1x128xf32>
        %c1 = arith.constant 1 : index
        %c0_41 = arith.constant 0 : index
        %62 = vector.load %arg6[%c1, %c0_41] : memref<3x128xf32, #tpu.memory_space<vmem>>, vector<1x128xf32>
        %63 = arith.mulf %49, %61 : vector<1x128xf32>
        %64 = arith.subf %62, %63 : vector<1x128xf32>
        %c0_42 = arith.constant 0 : index
        %c0_43 = arith.constant 0 : index
        %65 = vector.load %arg11[%c0_42, %c0_43] : memref<1x128xf32, #tpu.memory_space<vmem>>, vector<1x128xf32>
        tpu.vector_store %arg11[%c0_42, %c0_43], %61 {strides = array<i32>} : memref<1x128xf32, #tpu.memory_space<vmem>>, vector<1x128xf32>,
        %c0_44 = arith.constant 0 : index
        %c0_45 = arith.constant 0 : index
        %66 = vector.load %arg12[%c0_44, %c0_45] : memref<1x128xf32, #tpu.memory_space<vmem>>, vector<1x128xf32>
        tpu.vector_store %arg12[%c0_44, %c0_45], %64 {strides = array<i32>} : memref<1x128xf32, #tpu.memory_space<vmem>>, vector<1x128xf32>,
      } else {
      }
      %cst_28 = arith.constant 0.000000e+00 : f32
      %45 = vector.broadcast %cst_28 : f32 to vector<1x256xf32>
      %c0_29 = arith.constant 0 : index
      %c0_30 = arith.constant 0 : index
      %46 = vector.load %arg8[%c0_29, %c0_30] : memref<1x256xf32, #tpu.memory_space<vmem>>, vector<1x256xf32>
      tpu.vector_store %arg8[%c0_29, %c0_30], %45 {strides = array<i32>} : memref<1x256xf32, #tpu.memory_space<vmem>>, vector<1x256xf32>,
    } else {
    }
    %c2_i32 = arith.constant 2 : i32
    %17 = arith.cmpi eq, %arg0, %c2_i32 : i32
    %18 = arith.extui %17 : i1 to i32
    %c0_i32_5 = arith.constant 0 : i32
    %19 = arith.cmpi ne, %18, %c0_i32_5 : i32
    scf.if %19 {
      %c0_6 = arith.constant 0 : index
      %c0_7 = arith.constant 0 : index
      %20 = vector.load %arg9[%c0_6, %c0_7] : memref<1x128xf32, #tpu.memory_space<vmem>>, vector<1x128xf32>
      %21 = vector.broadcast %20 : vector<1x128xf32> to vector<256x128xf32>
      %22 = arith.mulf %10, %21 : vector<256x128xf32>
      %c0_8 = arith.constant 0 : index
      %c0_9 = arith.constant 0 : index
      %23 = vector.load %arg10[%c0_8, %c0_9] : memref<1x128xf32, #tpu.memory_space<vmem>>, vector<1x128xf32>
      %24 = vector.broadcast %23 : vector<1x128xf32> to vector<256x128xf32>
      %25 = arith.addf %22, %24 : vector<256x128xf32>
      %cst_10 = arith.constant 0.000000e+00 : f32
      %26 = vector.broadcast %cst_10 : f32 to vector<256x128xf32>
      %27 = arith.maximumf %25, %26 : vector<256x128xf32>
      %c0_11 = arith.constant 0 : index
      %c0_12 = arith.constant 0 : index
      %28 = vector.load %arg4[%c0_11, %c0_12] : memref<128x128xf32, #tpu.memory_space<vmem>>, vector<128x128xf32>
      %cst_13 = arith.constant dense<0.000000e+00> : vector<256x128xf32>
      %29 = tpu.matmul %27, %28, %cst_13 {dimension_numbers = #tpu.dot_dimension_numbers<[1], [0], [0], [1], [0, 0, 1, 1], [], []>} : vector<256x128xf32>, vector<128x128xf32>, vector<256x128xf32> -> vector<256x128xf32>
      %c0_14 = arith.constant 0 : index
      %c0_15 = arith.constant 0 : index
      %30 = vector.load %arg11[%c0_14, %c0_15] : memref<1x128xf32, #tpu.memory_space<vmem>>, vector<1x128xf32>
      %31 = vector.broadcast %30 : vector<1x128xf32> to vector<256x128xf32>
      %32 = arith.mulf %29, %31 : vector<256x128xf32>
      %c0_16 = arith.constant 0 : index
      %c0_17 = arith.constant 0 : index
      %33 = vector.load %arg12[%c0_16, %c0_17] : memref<1x128xf32, #tpu.memory_space<vmem>>, vector<1x128xf32>
      %34 = vector.broadcast %33 : vector<1x128xf32> to vector<256x128xf32>
      %35 = arith.addf %32, %34 : vector<256x128xf32>
      %cst_18 = arith.constant 0.000000e+00 : f32
      %36 = vector.broadcast %cst_18 : f32 to vector<256x128xf32>
      %37 = arith.maximumf %35, %36 : vector<256x128xf32>
      %c2 = arith.constant 2 : index
      %c0_19 = arith.constant 0 : index
      %38 = vector.load %arg6[%c2, %c0_19] : memref<3x128xf32, #tpu.memory_space<vmem>>, vector<1x128xf32>
      %cst_20 = arith.constant dense<0.000000e+00> : vector<1x256xf32>
      %39 = tpu.matmul %38, %37, %cst_20 {dimension_numbers = #tpu.dot_dimension_numbers<[1], [1], [0], [0], [0, 0, 1, 0], [], []>} : vector<1x128xf32>, vector<256x128xf32>, vector<1x256xf32> -> vector<1x256xf32>
      %c0_21 = arith.constant 0 : index
      %c0_22 = arith.constant 0 : index
      %40 = vector.load %arg7[%c0_21, %c0_22] : memref<1x1xf32, #tpu.memory_space<vmem>>, vector<1x1xf32>
      %41 = vector.broadcast %40 : vector<1x1xf32> to vector<1x256xf32>
      %42 = arith.addf %39, %41 : vector<1x256xf32>
      %cst_23 = arith.constant 0.000000e+00 : f32
      %43 = vector.broadcast %cst_23 : f32 to vector<1x256xf32>
      %44 = arith.subf %43, %42 : vector<1x256xf32>
      %45 = math.exp %44 : vector<1x256xf32>
      %cst_24 = arith.constant 1.000000e+00 : f32
      %46 = vector.broadcast %cst_24 : f32 to vector<1x256xf32>
      %47 = arith.addf %46, %45 : vector<1x256xf32>
      %cst_25 = arith.constant 1.000000e+00 : f32
      %48 = vector.broadcast %cst_25 : f32 to vector<1x256xf32>
      %49 = arith.divf %48, %47 : vector<1x256xf32>
      %c0_26 = arith.constant 0 : index
      %c0_27 = arith.constant 0 : index
      %50 = vector.load %arg8[%c0_26, %c0_27] : memref<1x256xf32, #tpu.memory_space<vmem>>, vector<1x256xf32>
      tpu.vector_store %arg8[%c0_26, %c0_27], %49 {strides = array<i32>} : memref<1x256xf32, #tpu.memory_space<vmem>>, vector<1x256xf32>,
    } else {
    }
    return
  }
  func.func @transform_0(%arg0: i32, %arg1: i32) -> (i32, i32) {
    %c0_i32 = arith.constant 0 : i32
    %c0_i32_0 = arith.constant 0 : i32
    return %arg1, %c0_i32 : i32, i32
  }
  func.func @transform_1(%arg0: i32, %arg1: i32) -> (i32, i32) {
    %c0_i32 = arith.constant 0 : i32
    %c0_i32_0 = arith.constant 0 : i32
    %c0_i32_1 = arith.constant 0 : i32
    return %c0_i32, %c0_i32_0 : i32, i32
  }
  func.func @transform_2(%arg0: i32, %arg1: i32) -> (i32, i32) {
    %c0_i32 = arith.constant 0 : i32
    %c0_i32_0 = arith.constant 0 : i32
    %c0_i32_1 = arith.constant 0 : i32
    return %c0_i32, %c0_i32_0 : i32, i32
  }
  func.func @transform_3(%arg0: i32, %arg1: i32) -> (i32, i32) {
    %c0_i32 = arith.constant 0 : i32
    %c0_i32_0 = arith.constant 0 : i32
    %c0_i32_1 = arith.constant 0 : i32
    return %c0_i32, %c0_i32_0 : i32, i32
  }
  func.func @transform_4(%arg0: i32, %arg1: i32) -> (i32, i32) {
    %c0_i32 = arith.constant 0 : i32
    %c0_i32_0 = arith.constant 0 : i32
    %c0_i32_1 = arith.constant 0 : i32
    return %c0_i32, %c0_i32_0 : i32, i32
  }
  func.func @transform_5(%arg0: i32, %arg1: i32) -> (i32, i32) {
    %c0_i32 = arith.constant 0 : i32
    %c0_i32_0 = arith.constant 0 : i32
    %c0_i32_1 = arith.constant 0 : i32
    return %c0_i32, %c0_i32_0 : i32, i32
  }
  func.func @transform_6(%arg0: i32, %arg1: i32) -> (i32, i32) {
    %c0_i32 = arith.constant 0 : i32
    %c0_i32_0 = arith.constant 0 : i32
    return %c0_i32, %arg1 : i32, i32
  }
}

</mosaic_0001>

<bundles_post_ra>
// kernel: mlp_forward.1
= control target key start
LH: loop header
LB: loop body
LE: loop exit
PB: predicated region body
PF: predicated region fallthrough
CT: control target
= control target key end

     0   :  { %s3016_s23 = smov 0   ;;  %s3018_s24 = smov 0   ;;  %s3945_s0 = inlined_call_operand.vmem [shape: f32[768,16], index: 0, kind: input, shape index: {}]   ;;  %s3946_s1 = inlined_call_operand.vmem [shape: f32[16,128], index: 1, kind: input, shape index: {}]   ;;  %s3947_s2 = inlined_call_operand.vmem [shape: f32[128,128], index: 2, kind: input, shape index: {}]   ;;  %s3948_s3 = inlined_call_operand.vmem [shape: f32[2,128], index: 3, kind: input, shape index: {}]   ;;  %s3949_s4 = inlined_call_operand.vmem [shape: f32[3,128], index: 4, kind: input, shape index: {}]   ;;  %s3950_s5 = inlined_call_operand.<no memory space> [shape: f32[1,1], index: 5, kind: input, shape index: {}]   ;;  %s3951_s6 = inlined_call_operand.vmem [shape: f32[1,768], index: 6, kind: output, shape index: {}]  }
   0x1   :  { %v11_v0 = vstv %s3950_s5  ;;  %s3020_s25 = smov 0   ;;  %s3022_s26 = smov 0  }
   0x2   :  { %12 = vst [vmem:[#allocation6] sm:$0x1] %v11_v0  ;;  %s3024_s27 = smov 0  }
   0x3 LB: > { %s27_s5 = sadd.s32 1, %s2960_s25  ;;  %s30_s28 = sadd.s32 1, %s2964_s26  ;;  %s2968_s27 = sphi %s3024_s27, %s18_s27   ;;  %s2964_s26 = sphi %s3022_s26, %s4021_s26   ;;  %s2960_s25 = sphi %s3020_s25, %s4020_s25   ;;  %s2956_s24 = sphi %s3018_s24, %s4019_s24   ;;  %s2952_s23 = sphi %s3016_s23, %s4018_s23  }
   0x4   : > { %p28_p0 = scmp.ge.s32.totalorder %s27_s5, 3  ;;  %p2061_p1 = scmp.ge.s32.totalorder %s2968_s27, 1 }
   0x5   : > { %p227_p2 = scmp.lt.s32.totalorder %s2968_s27, 10 }
   0x6   : > { %s4023_s5 = smov (%p28_p0, %s27_s5), 0  ;;  %s4025_s28 = smov (!%p28_p0, %s30_s28), %s2964_s26 }
   0x7   : > { %p228_p3 = pnand %p2061_p1, %p227_p2  ;;  %p32_p4 = scmp.ge.s32.totalorder %s4025_s28, 3 }
   0x9   : > { %s4027_s28 = smov (%p32_p4, %s4025_s28), 0  ;;  %231 = sbr.rel (%p228_p3) target bundleno = 1783 (0x6f7), region = 44 }
  0x10   : > { %s2064_s29 = sshll.u32 %s2952_s23, 1  ;;  %v3952_v1 = vlaneseq  ;;  %s2065_s30 = sshll.u32 %s2952_s23, 8  ;;  %v312_v2 = vld [vmem:[%s3946_s1] sm:$0xff]  ;;  %v313_v3 = vld [vmem:[%s3946_s1 + $0x8] sm:$0xff]  ;;  %vm314_vm1 = vcmask 130048  }
  0x11   : > { %p263_p5 = scmp.lt.s32.totalorder %s2064_s29, 5  ;;  %v271_v4 = vstv %s2065_s30  ;;  %v2639_v5 = vpack.c.bf16 %v313_v3, %v312_v2  ;;  %s2062_s11 = sshll.u32 %s2952_s23, 5 }
  0x12   : > { %v268_v6 = vand.u32 127, %v3952_v1  ;;  %p257_p6 = scmp.lt.s32.totalorder %s2062_s11, 95  ;;  %p2100_p7 = scmp.ne.s32.totalorder %s2956_s24, 0 }
  0x13   : > { %s4029_s29 = smov (!%p263_p5, %s2064_s29), 5  ;;  %2640 = vmatprep.subr.bf16.mxu0 %v2639_v5  ;;  %2867 = vmatprep.subr.bf16.mxu1 %v2639_v5  ;;  %p2101_p8 = scmp.ne.s32.totalorder (!%p2100_p7), %s2952_s23, 0 }
  0x14   : > { %v269_v7 = vadd.s32 128, %v268_v6  ;;  %v3060_v8 = vadd.s32 %v271_v4, %v268_v6  ;;  %2642 = vmatpush3.bf16.msra.mxu0 %v2639_v5  ;;  %2868 = vmatpush3.bf16.msra.mxu1 %v2639_v5  ;;  %s4031_s11 = smov (!%p257_p6, %s2062_s11), 95  ;;  %s3065_s14 = scalar_lea.vmem %s3951_s6, %s4029_s29 }
  0x15   : > { %s2063_s15 = sshll.u32 %s4031_s11, 3 }
  0x16   : > { %v3067_v9 = vadd.s32 %v271_v4, %v269_v7  ;;  %vm274_vm0 = vcmp.lt.s32.totalorder %v3060_v8, 600  ;;  %s3073_s18 = scalar_lea.vmem %s3945_s0, %s2063_s15 }
  0x17   : > { %v280_v10 = vld [vmem:[%s3073_s18] sm:$0xff]  ;;  %v281_v12 = vld [vmem:[%s3073_s18 + $0x8] sm:$0xff]  ;;  %v282_v14 = vld [vmem:[%s3073_s18 + $0x10] sm:$0xff] }
  0x18   : > { %vm275_vm2 = vcmp.lt.s32.totalorder %v3067_v9, 600  ;;  %v296_v11 = vld [vmem:[%s3073_s18 + $0x80] sm:$0xff]  ;;  %2431 = vmatprep.mubr.msk.f32.mxu0 %vm314_vm1, %v280_v10  ;;  %v297_v13 = vld [vmem:[%s3073_s18 + $0x88] sm:$0xff]  ;;  %v298_v15 = vld [vmem:[%s3073_s18 + $0x90] sm:$0xff] }
  0x19   : > { %2455 = vmatprep.mubr.msk.f32.mxu1 %vm314_vm1, %v296_v11  ;;  %2432 = vmatmul.mubr.msk.f32.vlgmr.msra.gmra.mrb[0].mxu0 %vm314_vm1, %v281_v12  ;;  %v283_v16 = vld [vmem:[%s3073_s18 + $0x18] sm:$0xff]  ;;  %v284_v18 = vld [vmem:[%s3073_s18 + $0x20] sm:$0xff]  ;;  %v285_v20 = vld [vmem:[%s3073_s18 + $0x28] sm:$0xff] }
  0x1a   : > { %2456 = vmatmul.mubr.msk.f32.vlgmr.msra.gmra.mrb[0].mxu1 %vm314_vm1, %v297_v13  ;;  %2434 = vmatprep.mubr.msk.f32.mxu0 %vm314_vm1, %v282_v14  ;;  %v299_v17 = vld [vmem:[%s3073_s18 + $0x98] sm:$0xff]  ;;  %v300_v19 = vld [vmem:[%s3073_s18 + $0xa0] sm:$0xff]  ;;  %v301_v21 = vld [vmem:[%s3073_s18 + $0xa8] sm:$0xff] }
  0x1b   : > { %2458 = vmatprep.mubr.msk.f32.mxu1 %vm314_vm1, %v298_v15  ;;  %v286_v22 = vld [vmem:[%s3073_s18 + $0x30] sm:$0xff]  ;;  %v287_v24 = vld [vmem:[%s3073_s18 + $0x38] sm:$0xff]  ;;  %v288_v26 = vld [vmem:[%s3073_s18 + $0x40] sm:$0xff] }
  0x1c   : > { %v302_v23 = vld [vmem:[%s3073_s18 + $0xb0] sm:$0xff]  ;;  %v303_v25 = vld [vmem:[%s3073_s18 + $0xb8] sm:$0xff]  ;;  %v304_v27 = vld [vmem:[%s3073_s18 + $0xc0] sm:$0xff] }
  0x1d   : > { %2435 = vmatmul.mubr.msk.f32.gmra.mrb[2].mxu0 %vm314_vm1, %v283_v16  ;;  %v289_v28 = vld [vmem:[%s3073_s18 + $0x48] sm:$0xff]  ;;  %v290_v30 = vld [vmem:[%s3073_s18 + $0x50] sm:$0xff]  ;;  %v291_v32 = vld [vmem:[%s3073_s18 + $0x58] sm:$0xff] }
  0x1e   : > { %2459 = vmatmul.mubr.msk.f32.gmra.mrb[2].mxu1 %vm314_vm1, %v299_v17  ;;  %2437 = vmatprep.mubr.msk.f32.mxu0 %vm314_vm1, %v284_v18  ;;  %v305_v29 = vld [vmem:[%s3073_s18 + $0xc8] sm:$0xff]  ;;  %v306_v31 = vld [vmem:[%s3073_s18 + $0xd0] sm:$0xff]  ;;  %v307_v33 = vld [vmem:[%s3073_s18 + $0xd8] sm:$0xff] }
  0x1f   : > { %2461 = vmatprep.mubr.msk.f32.mxu1 %vm314_vm1, %v300_v19  ;;  %v292_v34 = vld [vmem:[%s3073_s18 + $0x60] sm:$0xff]  ;;  %v293_v36 = vld [vmem:[%s3073_s18 + $0x68] sm:$0xff]  ;;  %v294_v38 = vld [vmem:[%s3073_s18 + $0x70] sm:$0xff] }
  0x20   : > { %v308_v35 = vld [vmem:[%s3073_s18 + $0xe0] sm:$0xff]  ;;  %v309_v37 = vld [vmem:[%s3073_s18 + $0xe8] sm:$0xff]  ;;  %v310_v39 = vld [vmem:[%s3073_s18 + $0xf0] sm:$0xff] }
  0x21   : > { %2438 = vmatmul.mubr.msk.f32.gmra.mrb[4].mxu0 %vm314_vm1, %v285_v20  ;;  %v295_v40 = vld [vmem:[%s3073_s18 + $0x78] sm:$0xff] }
  0x22   : > { %2462 = vmatmul.mubr.msk.f32.gmra.mrb[4].mxu1 %vm314_vm1, %v301_v21  ;;  %2440 = vmatprep.mubr.msk.f32.mxu0 %vm314_vm1, %v286_v22  ;;  %v311_v41 = vld [vmem:[%s3073_s18 + $0xf8] sm:$0xff] }
  0x23   : > { %2464 = vmatprep.mubr.msk.f32.mxu1 %vm314_vm1, %v302_v23 }
  0x25   : > { %2441 = vmatmul.mubr.msk.f32.gmra.mrb[6].mxu0 %vm314_vm1, %v287_v24 }
  0x26   : > { %2465 = vmatmul.mubr.msk.f32.gmra.mrb[6].mxu1 %vm314_vm1, %v303_v25  ;;  %2443 = vmatprep.mubr.msk.f32.mxu0 %vm314_vm1, %v288_v26 }
  0x27   : > { %2467 = vmatprep.mubr.msk.f32.mxu1 %vm314_vm1, %v304_v27 }
  0x29   : > { %2444 = vmatmul.mubr.msk.f32.gmra.mrb[8].mxu0 %vm314_vm1, %v289_v28 }
  0x2a   : > { %2468 = vmatmul.mubr.msk.f32.gmra.mrb[8].mxu1 %vm314_vm1, %v305_v29  ;;  %2446 = vmatprep.mubr.msk.f32.mxu0 %vm314_vm1, %v290_v30 }
  0x2b   : > { %2470 = vmatprep.mubr.msk.f32.mxu1 %vm314_vm1, %v306_v31 }
  0x2d   : > { %2447 = vmatmul.mubr.msk.f32.gmra.mrb[10].mxu0 %vm314_vm1, %v291_v32 }
  0x2e   : > { %2471 = vmatmul.mubr.msk.f32.gmra.mrb[10].mxu1 %vm314_vm1, %v307_v33  ;;  %2449 = vmatprep.mubr.msk.f32.mxu0 %vm314_vm1, %v292_v34 }
  0x2f   : > { %2473 = vmatprep.mubr.msk.f32.mxu1 %vm314_vm1, %v308_v35 }
  0x31   : > { %2450 = vmatmul.mubr.msk.f32.gmra.mrb[12].mxu0 %vm314_vm1, %v293_v36 }
  0x32   : > { %2474 = vmatmul.mubr.msk.f32.gmra.mrb[12].mxu1 %vm314_vm1, %v309_v37  ;;  %2452 = vmatprep.mubr.msk.f32.mxu0 %vm314_vm1, %v294_v38 }
  0x33   : > { %2476 = vmatprep.mubr.msk.f32.mxu1 %vm314_vm1, %v310_v39 }
  0x35   : > { %2453 = vmatmul.mubr.msk.f32.gmra.mrb[14].mxu0 %vm314_vm1, %v295_v40 }
  0x36   : > { %2477 = vmatmul.mubr.msk.f32.gmra.mrb[14].mxu1 %vm314_vm1, %v311_v41 }
  0xec   : > { %v3140_v42 = vpop.f32.mrb[0].mxu0 }
  0xed   : > { %v3142_v43 = vpop.f32.mrb[0].mxu1  ;;  %v3144_v44 = vpop.f32.mrb[1].mxu0 }
  0xee   : > { %3972 = vst [vmem:[#allocation7_spill] sm:$0xff] %v3142_v43  ;;  %v3146_v45 = vpop.f32.mrb[1].mxu1 }
  0xef   : > { %3973 = vst [vmem:[#allocation8_spill] sm:$0xff] %v3146_v45 }
  0xf0   : > { %v3148_v46 = vpop.f32.mrb[2].mxu0 }
  0xf1   : > { %v3150_v47 = vpop.f32.mrb[2].mxu1  ;;  %v3152_v48 = vpop.f32.mrb[3].mxu0 }
  0xf2   : > { %3974 = vst [vmem:[#allocation9_spill] sm:$0xff] %v3150_v47  ;;  %v3154_v49 = vpop.f32.mrb[3].mxu1 }
  0xf3   : > { %3975 = vst [vmem:[#allocation10_spill] sm:$0xff] %v3154_v49 }
  0xf4   : > { %v3156_v50 = vpop.f32.mrb[4].mxu0 }
  0xf5   : > { %v3158_v51 = vpop.f32.mrb[4].mxu1  ;;  %v3160_v52 = vpop.f32.mrb[5].mxu0 }
  0xf6   : > { %3976 = vst [vmem:[#allocation11_spill] sm:$0xff] %v3158_v51  ;;  %v3162_v53 = vpop.f32.mrb[5].mxu1 }
  0xf7   : > { %3977 = vst [vmem:[#allocation12_spill] sm:$0xff] %v3162_v53 }
  0xf8   : > { %v3164_v54 = vpop.f32.mrb[6].mxu0 }
  0xf9   : > { %3978 = vst [vmem:[#allocation13_spill] sm:$0xff] %v3164_v54  ;;  %v3166_v55 = vpop.f32.mrb[6].mxu1  ;;  %v3168_v56 = vpop.f32.mrb[7].mxu0 }
  0xfa   : > { %3979 = vst [vmem:[#allocation14_spill] sm:$0xff] %v3168_v56  ;;  %v3170_v57 = vpop.f32.mrb[7].mxu1 }
  0xfc   : > { %v3172_v58 = vpop.f32.mrb[8].mxu0 }
  0xfd   : > { %3980 = vst [vmem:[#allocation15_spill] sm:$0xff] %v3172_v58  ;;  %v3174_v59 = vpop.f32.mrb[8].mxu1  ;;  %v3176_v60 = vpop.f32.mrb[9].mxu0 }
  0xfe   : > { %3981 = vst [vmem:[#allocation16_spill] sm:$0xff] %v3176_v60  ;;  %v3178_v61 = vpop.f32.mrb[9].mxu1 }
 0x100   : > { %v3180_v62 = vpop.f32.mrb[10].mxu0 }
 0x101   : > { %3982 = vst [vmem:[#allocation17_spill] sm:$0xff] %v3180_v62  ;;  %v3182_v63 = vpop.f32.mrb[10].mxu1  ;;  %v3184_v0 = vpop.f32.mrb[11].mxu0 }
 0x102   : > { %3983 = vst [vmem:[#allocation18_spill] sm:$0xff] %v3184_v0  ;;  %v3186_v2 = vpop.f32.mrb[11].mxu1 }
 0x104   : > { %v3188_v3 = vpop.f32.mrb[12].mxu0  ;;  %639 = sbr.rel (%p2100_p7) target bundleno = 563 (0x233), region = 48 }
 0x105   : > { %3984 = vst [vmem:[#allocation19_spill] sm:$0xff] %v3188_v3  ;;  %v3190_v4 = vpop.f32.mrb[12].mxu1  ;;  %v3192_v5 = vpop.f32.mrb[13].mxu0 }
 0x106   : > { %3985 = vst [vmem:[#allocation20_spill] sm:$0xff] %v3192_v5  ;;  %v3194_v6 = vpop.f32.mrb[13].mxu1 }
 0x108   : > { %v3196_v7 = vpop.f32.mrb[14].mxu0 }
 0x109   : > { %3986 = vst [vmem:[#allocation21_spill] sm:$0xff] %v3196_v7  ;;  %v3198_v10 = vpop.f32.mrb[14].mxu1  ;;  %v3200_v11 = vpop.f32.mrb[15].mxu0 }
 0x10a   : > { %3987 = vst [vmem:[#allocation22_spill] sm:$0xff] %v3200_v11  ;;  %v3202_v12 = vpop.f32.mrb[15].mxu1 }
 0x10b   : > { %643 = sbr.rel (%p2101_p8) target bundleno = 274 (0x112), region = 52  ;;  %v2970_v13 = vmov (!%p2101_p8), 0.0  }
 0x10c   : > { %644 = vst [vmem:[#allocation2] sm:$0x1] (!%p2101_p8), %v2970_v13  ;;  %645 = vst [vmem:[#allocation3] sm:$0x1] (!%p2101_p8), %v2970_v13 }
 0x112 PF: > { %v2643_v14 = vpack.c.bf16 %v3142_v43, %v3146_v45  ;;  %v2645_v15 = vpack.c.bf16 %v3140_v42, %v3144_v44  ;;  %v736_v16 = vmul.f32 %v3146_v45, %v3146_v45  ;;  %v737_v17 = vmul.f32 %v3142_v43, %v3142_v43  ;;  %p2106_p9 = scmp.ne.s32.totalorder %s2952_s23, 2 }
 0x113   : > { %v720_v18 = vmul.f32 %v3144_v44, %v3144_v44  ;;  %v721_v19 = vmul.f32 %v3140_v42, %v3140_v42  ;;  %v2647_v20 = vpack.c.bf16 %v3150_v47, %v3154_v49  ;;  %v738_v22 = vmul.f32 %v3154_v49, %v3154_v49 }
 0x114   : > { %2644 = vmatprep.subr.bf16.mxu0 %v2643_v14  ;;  %v2675_v21 = vpack.c.bf16 %v737_v17, %v736_v16  ;;  %v739_v23 = vmul.f32 %v3150_v47, %v3150_v47  ;;  %v722_v24 = vmul.f32 %v3152_v48, %v3152_v48  ;;  %v2649_v26 = vpack.c.bf16 %v3148_v46, %v3152_v48 }
 0x115   : > { %2646 = vmatpush3.bf16.msra.mxu0 %v2645_v15  ;;  %v2677_v25 = vpack.c.bf16 %v721_v19, %v720_v18  ;;  %v723_v27 = vmul.f32 %v3148_v46, %v3148_v46  ;;  %v2651_v28 = vpack.c.bf16 %v3158_v51, %v3162_v53  ;;  %v740_v30 = vmul.f32 %v3162_v53, %v3162_v53 }
 0x116   : > { %2676 = vmatprep.subr.bf16.mxu1 %v2675_v21  ;;  %2648 = vmatprep.subr.bf16.mxu0 %v2647_v20  ;;  %v2679_v29 = vpack.c.bf16 %v739_v23, %v738_v22  ;;  %v741_v31 = vmul.f32 %v3158_v51, %v3158_v51  ;;  %v724_v33 = vmul.f32 %v3160_v52, %v3160_v52 }
 0x117   : > { %2678 = vmatpush3.bf16.msra.mxu1 %v2677_v25  ;;  %v2681_v32 = vpack.c.bf16 %v723_v27, %v722_v24  ;;  %v725_v34 = vmul.f32 %v3156_v50, %v3156_v50  ;;  %v742_v36 = vmul.f32 %v3170_v57, %v3170_v57  ;;  %v743_v37 = vmul.f32 %v3166_v55, %v3166_v55 }
 0x118   : > { %2680 = vmatprep.subr.bf16.mxu1 %v2679_v29  ;;  %v2683_v35 = vpack.c.bf16 %v741_v31, %v740_v30  ;;  %v2653_v38 = vpack.c.bf16 %v3156_v50, %v3160_v52  ;;  %v2655_v39 = vpack.c.bf16 %v3166_v55, %v3170_v57  ;;  %v726_v41 = vmul.f32 %v3168_v56, %v3168_v56 }
 0x119   : > { %2650 = vmatpush3.bf16.msra.mxu0 %v2649_v26  ;;  %v2685_v40 = vpack.c.bf16 %v725_v34, %v724_v33  ;;  %v727_v13 = vmul.f32 %v3164_v54, %v3164_v54  ;;  %v2687_v14 = vpack.c.bf16 %v743_v37, %v742_v36  ;;  %v744_v15 = vmul.f32 %v3178_v61, %v3178_v61 }
 0x11a   : > { %2652 = vmatprep.subr.bf16.mxu0 %v2651_v28  ;;  %v745_v16 = vmul.f32 %v3174_v59, %v3174_v59  ;;  %v2657_v17 = vpack.c.bf16 %v3164_v54, %v3168_v56  ;;  %v2659_v18 = vpack.c.bf16 %v3174_v59, %v3178_v61  ;;  %v728_v20 = vmul.f32 %v3176_v60, %v3176_v60 }
 0x11b   : > { %2682 = vmatpush3.bf16.msra.mxu1 %v2681_v32  ;;  %v2689_v19 = vpack.c.bf16 %v727_v13, %v726_v41  ;;  %v729_v21 = vmul.f32 %v3172_v58, %v3172_v58  ;;  %v746_v23 = vmul.f32 %v3186_v2, %v3186_v2  ;;  %v747_v24 = vmul.f32 %v3182_v63, %v3182_v63 }
 0x11c   : > { %2684 = vmatprep.subr.bf16.mxu1 %v2683_v35  ;;  %v2691_v22 = vpack.c.bf16 %v745_v16, %v744_v15  ;;  %v2661_v25 = vpack.c.bf16 %v3172_v58, %v3176_v60  ;;  %v2971_v26 = vmov 1.0   ;;  %v2663_v27 = vpack.c.bf16 %v3182_v63, %v3186_v2 }
 0x11d   : > { %2654 = vmatpush3.bf16.msra.mxu0 %v2653_v38  ;;  %2102 = vmatprep.mubr.msk.f32.mxu0 %vm275_vm2, %v2971_v26  ;;  %v2693_v28 = vpack.c.bf16 %v729_v21, %v728_v20  ;;  %v730_v29 = vmul.f32 %v3184_v0, %v3184_v0  ;;  %v731_v30 = vmul.f32 %v3180_v62, %v3180_v62 }
 0x11e   : > { %2656 = vmatprep.subr.bf16.mxu0 %v2655_v39  ;;  %2104 = vmatprep.mubr.msk.f32.mxu1 %vm275_vm2, %v2971_v26  ;;  %v2695_v31 = vpack.c.bf16 %v747_v24, %v746_v23  ;;  %v748_v32 = vmul.f32 %v3194_v6, %v3194_v6  ;;  %v749_v33 = vmul.f32 %v3190_v4, %v3190_v4 }
 0x11f   : > { %2686 = vmatpush3.bf16.msra.mxu1 %v2685_v40  ;;  %v2665_v34 = vpack.c.bf16 %v3180_v62, %v3184_v0  ;;  %v2667_v35 = vpack.c.bf16 %v3190_v4, %v3194_v6  ;;  %v2697_v36 = vpack.c.bf16 %v731_v30, %v730_v29  ;;  %v732_v37 = vmul.f32 %v3192_v5, %v3192_v5 }
 0x120   : > { %2688 = vmatprep.subr.bf16.mxu1 %v2687_v14  ;;  %v733_v38 = vmul.f32 %v3188_v3, %v3188_v3  ;;  %v2699_v39 = vpack.c.bf16 %v749_v33, %v748_v32  ;;  %v750_v40 = vmul.f32 %v3202_v12, %v3202_v12  ;;  %v751_v41 = vmul.f32 %v3198_v10, %v3198_v10 }
 0x121   : > { %2658 = vmatpush3.bf16.msra.mxu0 %v2657_v17  ;;  %v2669_v13 = vpack.c.bf16 %v3188_v3, %v3192_v5  ;;  %v2671_v14 = vpack.c.bf16 %v3198_v10, %v3202_v12  ;;  %v734_v16 = vmul.f32 %v3200_v11, %v3200_v11  ;;  %v735_v17 = vmul.f32 %v3196_v7, %v3196_v7 }
 0x122   : > { %2660 = vmatprep.subr.bf16.mxu0 %v2659_v18  ;;  %v2701_v15 = vpack.c.bf16 %v733_v38, %v732_v37  ;;  %v2703_v18 = vpack.c.bf16 %v751_v41, %v750_v40 }
 0x123   : > { %2690 = vmatpush3.bf16.msra.mxu1 %v2689_v19  ;;  %v2673_v19 = vpack.c.bf16 %v3196_v7, %v3200_v11  ;;  %v2705_v20 = vpack.c.bf16 %v735_v17, %v734_v16 }
 0x124   : > { %2692 = vmatprep.subr.bf16.mxu1 %v2691_v22  ;;  %v646_v22 = vld [vmem:[#allocation2] sm:$0x1] }
 0x125   : > { %2662 = vmatpush3.bf16.msra.mxu0 %v2661_v25 }
 0x126   : > { %2664 = vmatprep.subr.bf16.mxu0 %v2663_v27  ;;  %v719_v27 = vld [vmem:[#allocation3] sm:$0x1] }
 0x127   : > { %2694 = vmatpush3.bf16.msra.mxu1 %v2693_v28 }
 0x128   : > { %2696 = vmatprep.subr.bf16.mxu1 %v2695_v31 }
 0x129   : > { %2666 = vmatpush3.bf16.msra.mxu0 %v2665_v34 }
 0x12a   : > { %2668 = vmatprep.subr.bf16.mxu0 %v2667_v35 }
 0x12b   : > { %2698 = vmatpush3.bf16.msra.mxu1 %v2697_v36 }
 0x12c   : > { %2700 = vmatprep.subr.bf16.mxu1 %v2699_v39  ;;  %v835_v39 = vld [vmem:[%s3948_s3] sm:$0x1] (!%p2106_p9) }
 0x12d   : > { %2670 = vmatpush3.bf16.msra.mxu0 %v2669_v13  ;;  %v839_v13 = vld [vmem:[%s3948_s3 + $0x1] sm:$0x1] (!%p2106_p9) }
 0x12e   : > { %2672 = vmatprep.subr.bf16.mxu0 %v2671_v14 }
 0x12f   : > { %2702 = vmatpush3.bf16.msra.mxu1 %v2701_v15 }
 0x130   : > { %2704 = vmatprep.subr.bf16.mxu1 %v2703_v18 }
 0x131   : > { %2674 = vmatpush3.bf16.msra.mxu0 %v2673_v19 }
 0x133   : > { %2706 = vmatpush3.bf16.msra.mxu1 %v2705_v20 }
 0x134   : > { %2103 = vmatmul.mubr.msk.f32.vlgmr.msra.gmra.mrb[0].mxu0 %vm274_vm0, %v2971_v26 }
 0x136   : > { %2105 = vmatmul.mubr.msk.f32.vlgmr.msra.gmra.mrb[0].mxu1 %vm274_vm0, %v2971_v26 }
 0x207   : > { %v2189_v21 = vpop.f32.mrb[0].mxu0 }
 0x208   : > { %v2190_v23 = vpop.f32.mrb[1].mxu0 }
 0x209   : > { %v2191_v24 = vadd.f32 %v2190_v23, %v2189_v21  ;;  %v2224_v25 = vpop.f32.mrb[0].mxu1  ;;  %827 = sbr.rel (%p2106_p9) target bundleno = 561 (0x231), region = 56 }
 0x20a   : > { %v2225_v28 = vpop.f32.mrb[1].mxu1 }
 0x20b   : > { %v717_v29 = vadd.f32 %v2191_v24, %v646_v22  ;;  %v2226_v30 = vadd.f32 %v2225_v28, %v2224_v25 }
 0x20d   : > { %718 = vst [vmem:[#allocation2] sm:$0x1] %v717_v29  ;;  %v822_v31 = vadd.f32 %v2226_v30, %v719_v27 }
 0x20f   : > { %823 = vst [vmem:[#allocation3] sm:$0x1] %v822_v31 }
 0x214   : > { %v828_v32 = vld [vmem:[#allocation2] sm:$0x1] }
 0x215   : > { %v829_v34 = vmul.f32 0.0016666667, %v828_v32 }
 0x216   : > { %v830_v33 = vld [vmem:[#allocation3] sm:$0x1] }
 0x217   : > { %v831_v35 = vmul.f32 0.0016666667, %v830_v33  ;;  %v832_v26 = vmul.f32 %v829_v34, %v829_v34 }
 0x219   : > { %v833_v36 = vsub.f32 %v831_v35, %v832_v26 }
 0x21b   : > { %v834_v37 = vmax.f32 %v833_v36, 0.0 }
 0x21d   : > { %v836_v38 = vadd.f32 1e-05, %v834_v37 }
 0x21f   : > { %2917 = vrsqrt.f32 %v836_v38 }
 0x229   : > { %v2918_v40 = vpop.eup %2917 }
 0x22a   : > { %v838_v41 = vmul.f32 %v2918_v40, %v835_v39 }
 0x22c   : > { %842 = vst [vmem:[#allocation2] sm:$0x1] %v838_v41  ;;  %v840_v14 = vmul.f32 %v838_v41, %v829_v34 }
 0x22e   : > { %v841_v15 = vsub.f32 %v839_v13, %v840_v14 }
 0x230   : > { %843 = vst [vmem:[#allocation3] sm:$0x1] %v841_v15 }
 0x231 PF: > { %vm846_vm3 = vcmp.lt.s32.totalorder %v3952_v1, 256  ;;  %v2972_v16 = vmov 0.0  }
 0x232   : > { %848 = vst.msk [vmem:[%s3065_s14] sm:$0x3] %vm846_vm3, %v2972_v16 }
 0x233 PF: > { %p2107_p10 = scmp.ne.s32.totalorder %s2956_s24, 1 }
 0x234   : > { %p2108_p11 = scmp.ne.s32.totalorder (!%p2107_p10), %s2952_s23, 0 }
 0x235   : > { %852 = sbr.rel (%p2107_p10) target bundleno = 1180 (0x49c), region = 60 }
 0x23c   : > { %856 = sbr.rel (%p2108_p11) target bundleno = 579 (0x243), region = 64  ;;  %v2973_v17 = vmov (!%p2108_p11), 0.0  }
 0x23d   : > { %857 = vst [vmem:[#allocation4] sm:$0x1] (!%p2108_p11), %v2973_v17  ;;  %858 = vst [vmem:[#allocation5] sm:$0x1] (!%p2108_p11), %v2973_v17 }
 0x243 PF: > { %v969_v18 = vld [vmem:[%s3947_s2] sm:$0xff]  ;;  %v970_v19 = vld [vmem:[%s3947_s2 + $0x8] sm:$0xff]  ;;  %v971_v20 = vld [vmem:[%s3947_s2 + $0x10] sm:$0xff]  ;;  %p2115_p12 = scmp.ne.s32.totalorder %s2952_s23, 2 }
 0x244   : > { %v2707_v21 = vpack.c.bf16 %v970_v19, %v969_v18  ;;  %v972_v22 = vld [vmem:[%s3947_s2 + $0x18] sm:$0xff]  ;;  %v973_v24 = vld [vmem:[%s3947_s2 + $0x20] sm:$0xff]  ;;  %v974_v25 = vld [vmem:[%s3947_s2 + $0x28] sm:$0xff] }
 0x245   : > { %v2711_v23 = vpack.c.bf16 %v972_v22, %v971_v20  ;;  %v2715_v27 = vpack.c.bf16 %v974_v25, %v973_v24  ;;  %v3339_v28 = vld [vmem:[#allocation2] ss:$0 sm:$0xff]  ;;  %v3341_v29 = vld [vmem:[#allocation3] ss:$0 sm:$0xff]  ;;  %v975_v30 = vld [vmem:[%s3947_s2 + $0x30] sm:$0xff] }
 0x246   : > { %2708 = vmatprep.subr.bf16.mxu0 %v2707_v21  ;;  %v976_v31 = vld [vmem:[%s3947_s2 + $0x38] sm:$0xff]  ;;  %v866_v32 = vmul.f32 %v3339_v28, %v3144_v44  ;;  %v977_v35 = vld [vmem:[%s3947_s2 + $0x40] sm:$0xff]  ;;  %v978_v26 = vld [vmem:[%s3947_s2 + $0x48] sm:$0xff]  ;;  %v888_v14 = vmul.f32 %v3339_v28, %v3170_v57  ;;  %v867_v17 = vmul.f32 %v3140_v42, %v3339_v28  ;;  %v889_v18 = vmul.f32 %v3166_v55, %v3339_v28 }
 0x247   : > { %2710 = vmatpush3.bf16.msra.mxu0 %v2707_v21  ;;  %v2719_v34 = vpack.c.bf16 %v976_v31, %v975_v30  ;;  %v2723_v37 = vpack.c.bf16 %v978_v26, %v977_v35  ;;  %v979_v38 = vld [vmem:[%s3947_s2 + $0x50] sm:$0xff]  ;;  %v980_v39 = vld [vmem:[%s3947_s2 + $0x58] sm:$0xff]  ;;  %v981_v41 = vld [vmem:[%s3947_s2 + $0x60] sm:$0xff]  ;;  %v869_v24 = vmul.f32 %v3148_v46, %v3339_v28  ;;  %v891_v30 = vmul.f32 %v3174_v59, %v3339_v28 }
 0x248   : > { %2712 = vmatprep.subr.bf16.mxu0 %v2711_v23  ;;  %v905_v33 = vadd.f32 %v3341_v29, %v866_v32  ;;  %v2727_v40 = vpack.c.bf16 %v980_v39, %v979_v38  ;;  %v982_v13 = vld [vmem:[%s3947_s2 + $0x68] sm:$0xff]  ;;  %v983_v15 = vld [vmem:[%s3947_s2 + $0x70] sm:$0xff]  ;;  %v984_v16 = vld [vmem:[%s3947_s2 + $0x78] sm:$0xff]  ;;  %v3383_v20 = vadd.f32 %v3341_v29, %v888_v14  ;;  %v3386_v21 = vadd.f32 %v3341_v29, %v889_v18 }
 0x249   : > { %v2731_v19 = vpack.c.bf16 %v982_v13, %v981_v41  ;;  %v2735_v22 = vpack.c.bf16 %v984_v16, %v983_v15  ;;  %v906_v25 = vadd.f32 %v3341_v29, %v867_v17  ;;  %v892_v31 = vmul.f32 %v3339_v28, %v3186_v2 }
 0x24a   : > { %v937_v36 = vmax.f32 %v905_v33, 0.0  ;;  %v893_v32 = vmul.f32 %v3182_v63, %v3339_v28  ;;  %v894_v33 = vmul.f32 %v3339_v28, %v3194_v6  ;;  %v896_v35 = vmul.f32 %v3339_v28, %v3202_v12 }
 0x24b   : > { %2714 = vmatpush3.bf16.msra.mxu0 %v2711_v23  ;;  %v868_v23 = vmul.f32 %v3339_v28, %v3152_v48  ;;  %v897_v38 = vmul.f32 %v3198_v10, %v3339_v28  ;;  %v870_v15 = vmul.f32 %v3339_v28, %v3160_v52  ;;  %v938_v17 = vmax.f32 %v906_v25, 0.0 }
 0x24c   : > { %2716 = vmatprep.subr.bf16.mxu0 %v2715_v27  ;;  %2511 = vmatprep.mubr.f32.mxu0 %v937_v36  ;;  %v3411_v36 = vadd.f32 %v3341_v29, %v891_v30  ;;  %v3419_v39 = vadd.f32 %v3341_v29, %v893_v32  ;;  %v3428_v13 = vadd.f32 %v3341_v29, %v896_v35 }
 0x24d   : > { %v907_v14 = vadd.f32 %v3341_v29, %v868_v23  ;;  %v3434_v16 = vadd.f32 %v3341_v29, %v897_v38  ;;  %v908_v18 = vadd.f32 %v3341_v29, %v869_v24  ;;  %v875_v38 = vmul.f32 %v3172_v58, %v3339_v28 }
 0x24f   : > { %2718 = vmatpush3.bf16.msra.mxu0 %v2715_v27  ;;  %v890_v27 = vmul.f32 %v3339_v28, %v3178_v61  ;;  %v939_v30 = vmax.f32 %v907_v14, 0.0  ;;  %v940_v23 = vmax.f32 %v908_v18, 0.0 }
 0x250   : > { %2720 = vmatprep.subr.bf16.mxu0 %v2719_v34 }
 0x251   : > { %v3408_v26 = vadd.f32 %v3341_v29, %v890_v27  ;;  %v871_v27 = vmul.f32 %v3156_v50, %v3339_v28 }
 0x253   : > { %2722 = vmatpush3.bf16.msra.mxu0 %v2719_v34  ;;  %v895_v34 = vmul.f32 %v3190_v4, %v3339_v28  ;;  %v910_v32 = vadd.f32 %v3341_v29, %v871_v27  ;;  %v914_v27 = vadd.f32 %v3341_v29, %v875_v38 }
 0x254   : > { %2724 = vmatprep.subr.bf16.mxu0 %v2723_v37 }
 0x255   : > { %v3425_v41 = vadd.f32 %v3341_v29, %v895_v34  ;;  %v942_v34 = vmax.f32 %v910_v32, 0.0  ;;  %v946_v32 = vmax.f32 %v914_v27, 0.0 }
 0x257   : > { %2726 = vmatpush3.bf16.msra.mxu0 %v2723_v37  ;;  %v3414_v37 = vadd.f32 %v3341_v29, %v892_v31  ;;  %v909_v31 = vadd.f32 %v3341_v29, %v870_v15 }
 0x258   : > { %2728 = vmatprep.subr.bf16.mxu0 %v2727_v40 }
 0x259   : > { %v941_v25 = vmax.f32 %v909_v31, 0.0 }
 0x25b   : > { %2730 = vmatpush3.bf16.msra.mxu0 %v2727_v40  ;;  %v3422_v40 = vadd.f32 %v3341_v29, %v894_v33  ;;  %v873_v33 = vmul.f32 %v3164_v54, %v3339_v28 }
 0x25c   : > { %2732 = vmatprep.subr.bf16.mxu0 %v2731_v19 }
 0x25d   : > { %v912_v35 = vadd.f32 %v3341_v29, %v873_v33 }
 0x25f   : > { %2734 = vmatpush3.bf16.msra.mxu0 %v2731_v19  ;;  %v872_v19 = vmul.f32 %v3339_v28, %v3168_v56  ;;  %v944_v18 = vmax.f32 %v912_v35, 0.0 }
 0x260   : > { %2736 = vmatprep.subr.bf16.mxu0 %v2735_v22 }
 0x261   : > { %v911_v24 = vadd.f32 %v3341_v29, %v872_v19 }
 0x263   : > { %2738 = vmatpush3.bf16.msra.mxu0 %v2735_v22  ;;  %v874_v22 = vmul.f32 %v3339_v28, %v3176_v60  ;;  %v943_v14 = vmax.f32 %v911_v24, 0.0 }
 0x265   : > { %v913_v15 = vadd.f32 %v3341_v29, %v874_v22 }
 0x266   : > { %2512 = vmatmul.mubr.f32.vlgmr.msra.gmra.mrb[0].mxu0 %v938_v17  ;;  %v876_v17 = vmul.f32 %v3339_v28, %v3184_v0 }
 0x267   : > { %2514 = vmatprep.mubr.f32.mxu0 %v939_v30  ;;  %v877_v30 = vmul.f32 %v3180_v62, %v3339_v28  ;;  %v945_v31 = vmax.f32 %v913_v15, 0.0 }
 0x268   : > { %v915_v19 = vadd.f32 %v3341_v29, %v876_v17 }
 0x269   : > { %v916_v33 = vadd.f32 %v3341_v29, %v877_v30 }
 0x26a   : > { %2515 = vmatmul.mubr.f32.gmra.mrb[2].mxu0 %v940_v23  ;;  %v878_v23 = vmul.f32 %v3339_v28, %v3192_v5  ;;  %v947_v24 = vmax.f32 %v915_v19, 0.0 }
 0x26b   : > { %2517 = vmatprep.mubr.f32.mxu0 %v941_v25  ;;  %v879_v25 = vmul.f32 %v3188_v3, %v3339_v28  ;;  %v948_v35 = vmax.f32 %v916_v33, 0.0 }
 0x26c   : > { %v917_v22 = vadd.f32 %v3341_v29, %v878_v23 }
 0x26d   : > { %v918_v38 = vadd.f32 %v3341_v29, %v879_v25 }
 0x26e   : > { %2518 = vmatmul.mubr.f32.gmra.mrb[4].mxu0 %v942_v34  ;;  %v880_v34 = vmul.f32 %v3339_v28, %v3200_v11  ;;  %v949_v15 = vmax.f32 %v917_v22, 0.0 }
 0x26f   : > { %2520 = vmatprep.mubr.f32.mxu0 %v943_v14  ;;  %v881_v14 = vmul.f32 %v3196_v7, %v3339_v28  ;;  %v950_v27 = vmax.f32 %v918_v38, 0.0 }
 0x270   : > { %v919_v17 = vadd.f32 %v3341_v29, %v880_v34 }
 0x271   : > { %v920_v30 = vadd.f32 %v3341_v29, %v881_v14 }
 0x272   : > { %2521 = vmatmul.mubr.f32.gmra.mrb[6].mxu0 %v944_v18  ;;  %v882_v18 = vmul.f32 %v3339_v28, %v3146_v45  ;;  %v951_v19 = vmax.f32 %v919_v17, 0.0 }
 0x273   : > { %2523 = vmatprep.mubr.f32.mxu0 %v945_v31  ;;  %v883_v31 = vmul.f32 %v3142_v43, %v3339_v28  ;;  %v952_v33 = vmax.f32 %v920_v30, 0.0 }
 0x274   : > { %v921_v23 = vadd.f32 %v3341_v29, %v882_v18 }
 0x275   : > { %v922_v25 = vadd.f32 %v3341_v29, %v883_v31 }
 0x276   : > { %2524 = vmatmul.mubr.f32.gmra.mrb[8].mxu0 %v946_v32  ;;  %v884_v32 = vmul.f32 %v3339_v28, %v3154_v49  ;;  %v953_v22 = vmax.f32 %v921_v23, 0.0  ;;  %v959_v23 = vmax.f32 %v3383_v20, 0.0  ;;  %v966_v20 = vmax.f32 %v3425_v41, 0.0 }
 0x277   : > { %2526 = vmatprep.mubr.f32.mxu0 %v947_v24  ;;  %v885_v24 = vmul.f32 %v3150_v47, %v3339_v28  ;;  %v954_v38 = vmax.f32 %v922_v25, 0.0  ;;  %v963_v25 = vmax.f32 %v3414_v37, 0.0 }
 0x278   : > { %v923_v34 = vadd.f32 %v3341_v29, %v884_v32  ;;  %v960_v32 = vmax.f32 %v3386_v21, 0.0  ;;  %v967_v21 = vmax.f32 %v3428_v13, 0.0 }
 0x279   : > { %v924_v14 = vadd.f32 %v3341_v29, %v885_v24  ;;  %v965_v24 = vmax.f32 %v3422_v40, 0.0 }
 0x27a   : > { %2527 = vmatmul.mubr.f32.gmra.mrb[10].mxu0 %v948_v35  ;;  %v886_v35 = vmul.f32 %v3339_v28, %v3162_v53  ;;  %v955_v17 = vmax.f32 %v923_v34, 0.0 }
 0x27b   : > { %2529 = vmatprep.mubr.f32.mxu0 %v949_v15  ;;  %v887_v15 = vmul.f32 %v3158_v51, %v3339_v28  ;;  %v961_v28 = vmax.f32 %v3408_v26, 0.0  ;;  %v968_v26 = vmax.f32 %v3434_v16, 0.0 }
 0x27c   : > { %v925_v18 = vadd.f32 %v3341_v29, %v886_v35 }
 0x27d   : > { %v926_v30 = vadd.f32 %v3341_v29, %v887_v15  ;;  %v964_v29 = vmax.f32 %v3419_v39, 0.0 }
 0x27e   : > { %2530 = vmatmul.mubr.f32.gmra.mrb[12].mxu0 %v950_v27  ;;  %v956_v27 = vmax.f32 %v924_v14, 0.0  ;;  %v957_v31 = vmax.f32 %v925_v18, 0.0 }
 0x27f   : > { %2532 = vmatprep.mubr.f32.mxu0 %v951_v19  ;;  %v958_v19 = vmax.f32 %v926_v30, 0.0 }
 0x282   : > { %2533 = vmatmul.mubr.f32.gmra.mrb[14].mxu0 %v952_v33  ;;  %v962_v33 = vmax.f32 %v3411_v36, 0.0  ;;  %v3954_v36 = vmov 1.0  }
 0x283   : > { %2535 = vmatprep.mubr.f32.mxu0 %v953_v22  ;;  %2111 = vmatprep.mubr.msk.f32.mxu1 %vm275_vm2, %v3954_v36 }
 0x286   : > { %2536 = vmatmul.mubr.f32.gmra.mrb[16].mxu0 %v954_v38 }
 0x287   : > { %2538 = vmatprep.mubr.f32.mxu0 %v955_v17 }
 0x28a   : > { %2539 = vmatmul.mubr.f32.gmra.mrb[18].mxu0 %v956_v27 }
 0x28b   : > { %2541 = vmatprep.mubr.f32.mxu0 %v957_v31 }
 0x28e   : > { %2542 = vmatmul.mubr.f32.gmra.mrb[20].mxu0 %v958_v19 }
 0x28f   : > { %2544 = vmatprep.mubr.f32.mxu0 %v959_v23 }
 0x292   : > { %2545 = vmatmul.mubr.f32.gmra.mrb[22].mxu0 %v960_v32 }
 0x293   : > { %2547 = vmatprep.mubr.f32.mxu0 %v961_v28 }
 0x296   : > { %2548 = vmatmul.mubr.f32.gmra.mrb[24].mxu0 %v962_v33 }
 0x297   : > { %2550 = vmatprep.mubr.f32.mxu0 %v963_v25 }
 0x29a   : > { %2551 = vmatmul.mubr.f32.gmra.mrb[26].mxu0 %v964_v29 }
 0x29b   : > { %2553 = vmatprep.mubr.f32.mxu0 %v965_v24 }
 0x29e   : > { %2554 = vmatmul.mubr.f32.gmra.mrb[28].mxu0 %v966_v20 }
 0x29f   : > { %2556 = vmatprep.mubr.f32.mxu0 %v967_v21 }
 0x2a2   : > { %2557 = vmatmul.mubr.f32.gmra.mrb[30].mxu0 %v968_v26 }
 0x339   : > { %v2513_v37 = vpop.f32.mrb[0].mxu0 }
 0x33a   : > { %v3502_v39 = vmul.f32 %v2513_v37, %v2513_v37  ;;  %v1051_v40 = vpop.f32.mrb[1].mxu0 }
 0x33b   : > { %v3504_v22 = vmul.f32 %v1051_v40, %v1051_v40  ;;  %v2741_v41 = vpack.c.bf16 %v2513_v37, %v1051_v40 }
 0x33d   : > { %v2516_v34 = vpop.f32.mrb[2].mxu0 }
 0x33e   : > { %v3508_v35 = vmul.f32 %v2516_v34, %v2516_v34  ;;  %v1061_v16 = vpop.f32.mrb[3].mxu0 }
 0x33f   : > { %v2745_v38 = vpack.c.bf16 %v2516_v34, %v1061_v16  ;;  %v3510_v14 = vmul.f32 %v1061_v16, %v1061_v16 }
 0x341   : > { %v2519_v17 = vpop.f32.mrb[4].mxu0 }
 0x342   : > { %v3514_v18 = vmul.f32 %v2519_v17, %v2519_v17  ;;  %v1071_v27 = vpop.f32.mrb[5].mxu0 }
 0x343   : > { %v2749_v30 = vpack.c.bf16 %v2519_v17, %v1071_v27  ;;  %v3516_v31 = vmul.f32 %v1071_v27, %v1071_v27 }
 0x345   : > { %v3520_v23 = vpop.f32.mrb[6].mxu0 }
 0x346   : > { %v3524_v32 = vmul.f32 %v3520_v23, %v3520_v23  ;;  %v1081_v28 = vpop.f32.mrb[7].mxu0 }
 0x347   : > { %v2753_v33 = vpack.c.bf16 %v3520_v23, %v1081_v28  ;;  %v3527_v25 = vmul.f32 %v1081_v28, %v1081_v28 }
 0x349   : > { %v3531_v24 = vpop.f32.mrb[8].mxu0 }
 0x34a   : > { %v3535_v20 = vmul.f32 %v3531_v24, %v3531_v24  ;;  %v3537_v21 = vpop.f32.mrb[9].mxu0 }
 0x34b   : > { %v2757_v26 = vpack.c.bf16 %v3531_v24, %v3537_v21  ;;  %v3543_v37 = vmul.f32 %v3537_v21, %v3537_v21 }
 0x34d   : > { %v3547_v34 = vpop.f32.mrb[10].mxu0  ;;  %v3996_v9 = vpack.c.bf16 %v3535_v20, %v3543_v37 }
 0x34e   : > { %v3551_v16 = vmul.f32 %v3547_v34, %v3547_v34  ;;  %v3553_v17 = vpop.f32.mrb[11].mxu0 }
 0x34f   : > { %v3559_v23 = vmul.f32 %v3553_v17, %v3553_v17 }
 0x351   : > { %v3563_v24 = vpop.f32.mrb[12].mxu0 }
 0x352   : > { %v3567_v21 = vmul.f32 %v3563_v24, %v3563_v24  ;;  %v3569_v1 = vpop.f32.mrb[13].mxu0 }
 0x353   : > { %v3575_v29 = vmul.f32 %v3569_v1, %v3569_v1 }
 0x355   : > { %v3579_v15 = vpop.f32.mrb[14].mxu0 }
 0x356   : > { %v3583_v28 = vmul.f32 %v3579_v15, %v3579_v15  ;;  %v3585_v13 = vpop.f32.mrb[15].mxu0 }
 0x357   : > { %v3591_v40 = vmul.f32 %v3585_v13, %v3585_v13 }
 0x359   : > { %v2537_v51 = vpop.f32.mrb[16].mxu0 }
 0x35a   : > { %v3595_v19 = vmul.f32 %v2537_v51, %v2537_v51  ;;  %v1131_v53 = vpop.f32.mrb[17].mxu0 }
 0x35b   : > { %v1300_v47 = vmul.f32 %v1131_v53, %v1131_v53  ;;  %v2739_v49 = vpack.c.bf16 %v2537_v51, %v1131_v53 }
 0x35d   : > { %v2771_v43 = vpack.c.bf16 %v3595_v19, %v1300_v47  ;;  %v2540_v45 = vpop.f32.mrb[18].mxu0  ;;  %2740 = vmatprep.subr.bf16.mxu1 %v2739_v49 }
 0x35e   : > { %v1303_v7 = vmul.f32 %v2540_v45, %v2540_v45  ;;  %v1141_v11 = vpop.f32.mrb[19].mxu0  ;;  %2742 = vmatpush3.bf16.msra.mxu1 %v2741_v41 }
 0x35f   : > { %v2743_v36 = vpack.c.bf16 %v2540_v45, %v1141_v11  ;;  %v1302_v3 = vmul.f32 %v1141_v11, %v1141_v11 }
 0x361   : > { %v2775_v5 = vpack.c.bf16 %v1303_v7, %v1302_v3  ;;  %v2543_v62 = vpop.f32.mrb[20].mxu0  ;;  %2744 = vmatprep.subr.bf16.mxu1 %v2743_v36 }
 0x362   : > { %v1305_v0 = vmul.f32 %v2543_v62, %v2543_v62  ;;  %v1151_v27 = vpop.f32.mrb[21].mxu0  ;;  %2746 = vmatpush3.bf16.msra.mxu1 %v2745_v38 }
 0x363   : > { %v2747_v58 = vpack.c.bf16 %v2543_v62, %v1151_v27  ;;  %v1304_v60 = vmul.f32 %v1151_v27, %v1151_v27 }
 0x365   : > { %v2779_v54 = vpack.c.bf16 %v1305_v0, %v1304_v60  ;;  %v2546_v56 = vpop.f32.mrb[22].mxu0  ;;  %2748 = vmatprep.subr.bf16.mxu1 %v2747_v58 }
 0x366   : > { %v1307_v51 = vmul.f32 %v2546_v56, %v2546_v56  ;;  %v1161_v47 = vpop.f32.mrb[23].mxu0  ;;  %2750 = vmatpush3.bf16.msra.mxu1 %v2749_v30 }
 0x367   : > { %v2751_v49 = vpack.c.bf16 %v2546_v56, %v1161_v47  ;;  %v1306_v53 = vmul.f32 %v1161_v47, %v1161_v47  ;;  %v3988_v47 = vpack.c.bf16 %v3547_v34, %v3553_v17  ;;  %v3991_v34 = vmov 1.0  }
 0x368   : > { %v3992_v17 = vpack.c.bf16 %v3502_v39, %v3504_v22  ;;  %v3999_v39 = vpack.c.bf16 %v3583_v28, %v3591_v40 }
 0x369   : > { %v2783_v19 = vpack.c.bf16 %v1307_v51, %v1306_v53  ;;  %v2549_v41 = vpop.f32.mrb[24].mxu0  ;;  %2752 = vmatprep.subr.bf16.mxu1 %v2751_v49 }
 0x36a   : > { %v1309_v45 = vmul.f32 %v2549_v41, %v2549_v41  ;;  %v1171_v3 = vpop.f32.mrb[25].mxu0  ;;  %2754 = vmatpush3.bf16.msra.mxu1 %v2753_v33 }
 0x36b   : > { %v2755_v7 = vpack.c.bf16 %v2549_v41, %v1171_v3  ;;  %v1308_v11 = vmul.f32 %v1171_v3, %v1171_v3 }
 0x36d   : > { %v2787_v36 = vpack.c.bf16 %v1309_v45, %v1308_v11  ;;  %v2552_v38 = vpop.f32.mrb[26].mxu0  ;;  %2756 = vmatprep.subr.bf16.mxu1 %v2755_v7 }
 0x36e   : > { %v1311_v62 = vmul.f32 %v2552_v38, %v2552_v38  ;;  %v1181_v60 = vpop.f32.mrb[27].mxu0  ;;  %2758 = vmatpush3.bf16.msra.mxu1 %v2757_v26  ;;  %v3989_v26 = vpack.c.bf16 %v3563_v24, %v3569_v1  ;;  %v3993_v1 = vpack.c.bf16 %v3508_v35, %v3510_v14  ;;  %v1210_v35 = vld [vmem:[#allocation4] sm:$0x1] }
 0x36f   : > { %v2759_v58 = vpack.c.bf16 %v2552_v38, %v1181_v60  ;;  %v1310_v0 = vmul.f32 %v1181_v60, %v1181_v60 }
 0x371   : > { %v2791_v27 = vpack.c.bf16 %v1311_v62, %v1310_v0  ;;  %v2555_v30 = vpop.f32.mrb[28].mxu0  ;;  %2760 = vmatprep.subr.bf16.mxu1 %v2759_v58  ;;  %v3990_v62 = vpack.c.bf16 %v3579_v15, %v3585_v13  ;;  %v3995_v13 = vpack.c.bf16 %v3524_v32, %v3527_v25  ;;  %v1283_v32 = vld [vmem:[#allocation5] sm:$0x1]  ;;  %v1403_v58 = vld [vmem:[%s3949_s4 + $0x1] sm:$0x1] (!%p2115_p12) }
 0x372   : > { %v1313_v56 = vmul.f32 %v2555_v30, %v2555_v30  ;;  %v1191_v51 = vpop.f32.mrb[29].mxu0  ;;  %2762 = vmatpush3.bf16.msra.mxu1 %v3988_v47 }
 0x373   : > { %v2763_v33 = vpack.c.bf16 %v2555_v30, %v1191_v51  ;;  %v1312_v49 = vmul.f32 %v1191_v51, %v1191_v51 }
 0x375   : > { %v2795_v53 = vpack.c.bf16 %v1313_v56, %v1312_v49  ;;  %v2558_v41 = vpop.f32.mrb[30].mxu0  ;;  %2764 = vmatprep.subr.bf16.mxu1 %v2763_v33 }
 0x376   : > { %v1315_v45 = vmul.f32 %v2558_v41, %v2558_v41  ;;  %v1201_v3 = vpop.f32.mrb[31].mxu0  ;;  %2766 = vmatpush3.bf16.msra.mxu1 %v3989_v26 }
 0x377   : > { %v2767_v7 = vpack.c.bf16 %v2558_v41, %v1201_v3  ;;  %v1314_v11 = vmul.f32 %v1201_v3, %v1201_v3 }
 0x379   : > { %v2799_v38 = vpack.c.bf16 %v1315_v45, %v1314_v11  ;;  %2768 = vmatprep.subr.bf16.mxu1 %v2767_v7 }
 0x37a   : > { %2770 = vmatpush3.bf16.msra.mxu1 %v3990_v62 }
 0x37b   : > { %2772 = vmatprep.subr.bf16.mxu1 %v2771_v43  ;;  %v3994_v43 = vpack.c.bf16 %v3514_v18, %v3516_v31 }
 0x37d   : > { %2112 = vmatmul.mubr.msk.f32.vlgmr.msra.gmra.mrb[0].mxu1 %vm274_vm0, %v3991_v34 }
 0x37e   : > { %2774 = vmatpush3.bf16.msra.mxu1 %v3992_v17  ;;  %2113 = vmatprep.mubr.msk.f32.mxu1 %vm275_vm2, %v3991_v34 }
 0x37f   : > { %2776 = vmatprep.subr.bf16.mxu1 %v2775_v5  ;;  %v3997_v5 = vpack.c.bf16 %v3551_v16, %v3559_v23 }
 0x382   : > { %2778 = vmatpush3.bf16.msra.mxu1 %v3993_v1 }
 0x383   : > { %2780 = vmatprep.subr.bf16.mxu1 %v2779_v54  ;;  %v3998_v54 = vpack.c.bf16 %v3567_v21, %v3575_v29 }
 0x386   : > { %2782 = vmatpush3.bf16.msra.mxu1 %v3994_v43 }
 0x387   : > { %2784 = vmatprep.subr.bf16.mxu1 %v2783_v19  ;;  %v1399_v19 = vld [vmem:[%s3949_s4] sm:$0x1] (!%p2115_p12) }
 0x38a   : > { %2786 = vmatpush3.bf16.msra.mxu1 %v3995_v13 }
 0x38b   : > { %2788 = vmatprep.subr.bf16.mxu1 %v2787_v36 }
 0x38e   : > { %2790 = vmatpush3.bf16.msra.mxu1 %v3996_v9 }
 0x38f   : > { %2792 = vmatprep.subr.bf16.mxu1 %v2791_v27 }
 0x392   : > { %2794 = vmatpush3.bf16.msra.mxu1 %v3997_v5 }
 0x393   : > { %2796 = vmatprep.subr.bf16.mxu1 %v2795_v53 }
 0x396   : > { %2798 = vmatpush3.bf16.msra.mxu1 %v3998_v54 }
 0x397   : > { %2800 = vmatprep.subr.bf16.mxu1 %v2799_v38 }
 0x39a   : > { %2802 = vmatpush3.bf16.msra.mxu1 %v3999_v39 }
 0x39d   : > { %2114 = vmatmul.mubr.msk.f32.vlgmr.msra.gmra.mrb[2].mxu1 %vm274_vm0, %v3991_v34 }
 0x450   : > { %v2307_v22 = vpop.f32.mrb[0].mxu1 }
 0x451   : > { %v2308_v14 = vpop.f32.mrb[1].mxu1 }
 0x452   : > { %v2309_v15 = vadd.f32 %v2308_v14, %v2307_v22 }
 0x454   : > { %v1281_v18 = vadd.f32 %v2309_v15, %v1210_v35 }
 0x456   : > { %1282 = vst [vmem:[#allocation4] sm:$0x1] %v1281_v18 }
 0x45d   : > { %v1392_v37 = vld [vmem:[#allocation4] sm:$0x1] (!%p2115_p12) }
 0x45e   : > { %v1393_v16 = vmul.f32 (!%p2115_p12), 0.0016666667, %v1392_v37 }
 0x460   : > { %v1396_v23 = vmul.f32 (!%p2115_p12), %v1393_v16, %v1393_v16 }
 0x470   : > { %v2342_v31 = vpop.f32.mrb[2].mxu1  ;;  %1391 = sbr.rel (%p2115_p12) target bundleno = 1176 (0x498), region = 68 }
 0x471   : > { %v2343_v25 = vpop.f32.mrb[3].mxu1 }
 0x472   : > { %v2344_v29 = vadd.f32 %v2343_v25, %v2342_v31 }
 0x474   : > { %v1386_v20 = vadd.f32 %v2344_v29, %v1283_v32 }
 0x476   : > { %1387 = vst [vmem:[#allocation5] sm:$0x1] %v1386_v20 }
 0x47d   : > { %v1394_v40 = vld [vmem:[#allocation5] sm:$0x1] }
 0x47e   : > { %v1395_v8 = vmul.f32 0.0016666667, %v1394_v40 }
 0x480   : > { %v1397_v28 = vsub.f32 %v1395_v8, %v1396_v23 }
 0x482   : > { %v1398_v24 = vmax.f32 %v1397_v28, 0.0 }
 0x484   : > { %v1400_v21 = vadd.f32 1e-05, %v1398_v24 }
 0x486   : > { %2919 = vrsqrt.f32 %v1400_v21 }
 0x490   : > { %v2920_v36 = vpop.eup %2919 }
 0x491   : > { %v1402_v60 = vmul.f32 %v2920_v36, %v1399_v19 }
 0x493   : > { %1406 = vst [vmem:[#allocation4] sm:$0x1] %v1402_v60  ;;  %v1404_v0 = vmul.f32 %v1402_v60, %v1393_v16 }
 0x495   : > { %v1405_v27 = vsub.f32 %v1403_v58, %v1404_v0 }
 0x497   : > { %1407 = vst [vmem:[#allocation5] sm:$0x1] %v1405_v27 }
 0x498 PF: > { %v4000_v30 = vlaneseq  ;;  %v2975_v56 = vmov 0.0  }
 0x49a   : > { %vm1410_vm4 = vcmp.lt.s32.totalorder %v4000_v30, 256 }
 0x49b   : > { %1412 = vst.msk [vmem:[%s3065_s14] sm:$0x3] %vm1410_vm4, %v2975_v56 }
 0x49c PF: > { %p2116_p13 = scmp.ne.s32.totalorder %s2956_s24, 2 }
 0x49d   : > { %v1527_v51 = vld [vmem:[%s3947_s2] sm:$0xff] (!%p2116_p13)  ;;  %v1528_v47 = vld [vmem:[%s3947_s2 + $0x8] sm:$0xff] (!%p2116_p13)  ;;  %v1529_v33 = vld [vmem:[%s3947_s2 + $0x10] sm:$0xff] (!%p2116_p13) }
 0x49e   : > { %1416 = sbr.rel (%p2116_p13) target bundleno = 1783 (0x6f7), region = 72  ;;  %v2803_v49 = vpack.c.bf16 (!%p2116_p13), %v1528_v47, %v1527_v51  ;;  %v1530_v53 = vld [vmem:[%s3947_s2 + $0x18] sm:$0xff] (!%p2116_p13)  ;;  %v1531_v45 = vld [vmem:[%s3947_s2 + $0x20] sm:$0xff] (!%p2116_p13)  ;;  %v1532_v3 = vld [vmem:[%s3947_s2 + $0x28] sm:$0xff] (!%p2116_p13) }
 0x49f   : > { %v2807_v41 = vpack.c.bf16 (!%p2116_p13), %v1530_v53, %v1529_v33  ;;  %v2811_v26 = vpack.c.bf16 (!%p2116_p13), %v1532_v3, %v1531_v45  ;;  %v3668_v7 = vld [vmem:[#allocation2] ss:$0 sm:$0xff] (!%p2116_p13)  ;;  %v3670_v11 = vld [vmem:[#allocation3] ss:$0 sm:$0xff] (!%p2116_p13)  ;;  %v1533_v38 = vld [vmem:[%s3947_s2 + $0x30] sm:$0xff] (!%p2116_p13) }
 0x4a0   : > { %2804 = vmatprep.subr.bf16.mxu0 (!%p2116_p13), %v2803_v49  ;;  %v1534_v62 = vld [vmem:[%s3947_s2 + $0x38] sm:$0xff] (!%p2116_p13)  ;;  %v1424_v34 = vmul.f32 (!%p2116_p13), %v3668_v7, %v3144_v44  ;;  %v1535_v43 = vld [vmem:[%s3947_s2 + $0x40] sm:$0xff] (!%p2116_p13)  ;;  %v1536_v13 = vld [vmem:[%s3947_s2 + $0x48] sm:$0xff] (!%p2116_p13)  ;;  %v1446_v14 = vmul.f32 (!%p2116_p13), %v3668_v7, %v3170_v57  ;;  %v1425_v31 = vmul.f32 (!%p2116_p13), %v3140_v42, %v3668_v7  ;;  %v1447_v32 = vmul.f32 (!%p2116_p13), %v3166_v55, %v3668_v7 }
 0x4a1   : > { %2806 = vmatpush3.bf16.msra.mxu0 (!%p2116_p13), %v2803_v49  ;;  %v2815_v1 = vpack.c.bf16 (!%p2116_p13), %v1534_v62, %v1533_v38  ;;  %v2819_v5 = vpack.c.bf16 (!%p2116_p13), %v1536_v13, %v1535_v43  ;;  %v1537_v44 = vld [vmem:[%s3947_s2 + $0x50] sm:$0xff] (!%p2116_p13)  ;;  %v1538_v54 = vld [vmem:[%s3947_s2 + $0x58] sm:$0xff] (!%p2116_p13)  ;;  %v1539_v22 = vld [vmem:[%s3947_s2 + $0x60] sm:$0xff] (!%p2116_p13)  ;;  %v1426_v37 = vmul.f32 (!%p2116_p13), %v3668_v7, %v3152_v48  ;;  %v1427_v40 = vmul.f32 (!%p2116_p13), %v3148_v46, %v3668_v7 }
 0x4a2   : > { %2808 = vmatprep.subr.bf16.mxu0 (!%p2116_p13), %v2807_v41  ;;  %v1463_v17 = vadd.f32 (!%p2116_p13), %v3670_v11, %v1424_v34  ;;  %v2823_v39 = vpack.c.bf16 (!%p2116_p13), %v1538_v54, %v1537_v44  ;;  %v1540_v35 = vld [vmem:[%s3947_s2 + $0x68] sm:$0xff] (!%p2116_p13)  ;;  %v1541_v15 = vld [vmem:[%s3947_s2 + $0x70] sm:$0xff] (!%p2116_p13)  ;;  %v1542_v18 = vld [vmem:[%s3947_s2 + $0x78] sm:$0xff] (!%p2116_p13)  ;;  %v3712_v29 = vadd.f32 (!%p2116_p13), %v3670_v11, %v1446_v14  ;;  %v3715_v57 = vadd.f32 (!%p2116_p13), %v3670_v11, %v1447_v32 }
 0x4a3   : > { %v2827_v25 = vpack.c.bf16 (!%p2116_p13), %v1540_v35, %v1539_v22  ;;  %v2831_v20 = vpack.c.bf16 (!%p2116_p13), %v1542_v18, %v1541_v15  ;;  %v1464_v42 = vadd.f32 (!%p2116_p13), %v3670_v11, %v1425_v31  ;;  %v1448_v55 = vmul.f32 (!%p2116_p13), %v3668_v7, %v3178_v61  ;;  %v4001_v30 = vld [vmem:[#allocation14_spill] sm:$0xff] (!%p2116_p13)  ;;  %v4002_v47 = vld [vmem:[#allocation13_spill] sm:$0xff] (!%p2116_p13)  ;;  %v4008_v15 = vld [vmem:[#allocation19_spill] sm:$0xff] (!%p2116_p13) }
 0x4a4   : > { %v1495_v9 = vmax.f32 (!%p2116_p13), %v1463_v17, 0.0  ;;  %v1449_v16 = vmul.f32 (!%p2116_p13), %v3174_v59, %v3668_v7  ;;  %v1450_v8 = vmul.f32 (!%p2116_p13), %v3668_v7, %v3186_v2  ;;  %v1451_v23 = vmul.f32 (!%p2116_p13), %v3182_v63, %v3668_v7  ;;  %v4005_v17 = vld [vmem:[#allocation18_spill] sm:$0xff] (!%p2116_p13) }
 0x4a5   : > { %2810 = vmatpush3.bf16.msra.mxu0 %v2807_v41  ;;  %v1452_v48 = vmul.f32 %v3668_v7, %v3194_v6  ;;  %v1453_v46 = vmul.f32 %v3190_v4, %v3668_v7  ;;  %v1454_v28 = vmul.f32 %v3668_v7, %v3202_v12  ;;  %v3737_v61 = vadd.f32 %v3670_v11, %v1448_v55  ;;  %v4003_v41 = vld [vmem:[#allocation16_spill] sm:$0xff] }
 0x4a6   : > { %2812 = vmatprep.subr.bf16.mxu0 %v2811_v26  ;;  %2591 = vmatprep.mubr.f32.mxu0 %v1495_v9  ;;  %v3740_v59 = vadd.f32 %v3670_v11, %v1449_v16  ;;  %v3743_v2 = vadd.f32 %v3670_v11, %v1450_v8  ;;  %v1455_v63 = vmul.f32 %v3198_v10, %v3668_v7  ;;  %v1496_v36 = vmax.f32 %v1464_v42, 0.0  ;;  %v4006_v9 = vld [vmem:[#allocation17_spill] sm:$0xff] }
 0x4a7   : > { %v3748_v6 = vadd.f32 %v3670_v11, %v1451_v23  ;;  %v3751_v4 = vadd.f32 %v3670_v11, %v1452_v48  ;;  %v3754_v12 = vadd.f32 %v3670_v11, %v1453_v46  ;;  %v3757_v24 = vadd.f32 %v3670_v11, %v1454_v28  ;;  %v4010_v42 = vld [vmem:[#allocation21_spill] sm:$0xff]  ;;  %v4011_v23 = vld [vmem:[#allocation8_spill] sm:$0xff] }
 0x4a8   : > { %v1465_v21 = vadd.f32 %v3670_v11, %v1426_v37  ;;  %v1428_v19 = vmul.f32 %v3668_v7, %v3160_v52  ;;  %v3763_v10 = vadd.f32 %v3670_v11, %v1455_v63  ;;  %v1466_v60 = vadd.f32 %v3670_v11, %v1427_v40  ;;  %v4012_v63 = vld [vmem:[#allocation7_spill] sm:$0xff] }
 0x4a9   : > { %2814 = vmatpush3.bf16.msra.mxu0 %v2811_v26  ;;  %v1429_v58 = vmul.f32 %v3156_v50, %v3668_v7  ;;  %v1430_v56 = vmul.f32 %v3668_v7, %v4001_v30  ;;  %v1431_v33 = vmul.f32 %v4002_v47, %v3668_v7  ;;  %v1432_v50 = vmul.f32 %v3668_v7, %v4003_v41  ;;  %v4004_v26 = vld [vmem:[#allocation15_spill] sm:$0xff]  ;;  %v4014_v30 = vld [vmem:[#allocation9_spill] sm:$0xff]  ;;  %v4015_v47 = vld [vmem:[#allocation12_spill] sm:$0xff] }
 0x4aa   : > { %2816 = vmatprep.subr.bf16.mxu0 %v2815_v1  ;;  %v1497_v0 = vmax.f32 %v1465_v21, 0.0  ;;  %v1467_v27 = vadd.f32 %v3670_v11, %v1428_v19  ;;  %v1498_v51 = vmax.f32 %v1466_v60, 0.0  ;;  %v1433_v38 = vmul.f32 %v4004_v26, %v3668_v7  ;;  %v4013_v60 = vld [vmem:[#allocation10_spill] sm:$0xff]  ;;  %v4016_v41 = vld [vmem:[#allocation11_spill] sm:$0xff] }
 0x4ab   : > { %v1468_v52 = vadd.f32 %v3670_v11, %v1429_v58  ;;  %v1469_v53 = vadd.f32 %v3670_v11, %v1430_v56  ;;  %v1470_v3 = vadd.f32 %v3670_v11, %v1431_v33  ;;  %v1471_v34 = vadd.f32 %v3670_v11, %v1432_v50 }
 0x4ac   : > { %v1499_v49 = vmax.f32 %v1467_v27, 0.0  ;;  %v1472_v13 = vadd.f32 %v3670_v11, %v1433_v38  ;;  %v1437_v18 = vmul.f32 %v4008_v15, %v3668_v7  ;;  %v1439_v55 = vmul.f32 %v4010_v42, %v3668_v7 }
 0x4ad   : > { %2818 = vmatpush3.bf16.msra.mxu0 %v2815_v1  ;;  %v1500_v45 = vmax.f32 %v1468_v52, 0.0  ;;  %v1501_v62 = vmax.f32 %v1469_v53, 0.0  ;;  %v1434_v1 = vmul.f32 %v3668_v7, %v4005_v17  ;;  %v1502_v43 = vmax.f32 %v1470_v3, 0.0 }
 0x4ae   : > { %2820 = vmatprep.subr.bf16.mxu0 %v2819_v5  ;;  %v1503_v44 = vmax.f32 %v1471_v34, 0.0  ;;  %v1504_v35 = vmax.f32 %v1472_v13, 0.0  ;;  %v1476_v40 = vadd.f32 %v3670_v11, %v1437_v18  ;;  %v1440_v48 = vmul.f32 %v3668_v7, %v4011_v23 }
 0x4af   : > { %v1473_v54 = vadd.f32 %v3670_v11, %v1434_v1  ;;  %v1478_v28 = vadd.f32 %v3670_v11, %v1439_v55  ;;  %v1441_v21 = vmul.f32 %v4012_v63, %v3668_v7  ;;  %v1442_v58 = vmul.f32 %v3668_v7, %v4013_v60 }
 0x4b0   : > { %v1508_v46 = vmax.f32 %v1476_v40, 0.0  ;;  %v1443_v56 = vmul.f32 %v4014_v30, %v3668_v7  ;;  %v1444_v33 = vmul.f32 %v3668_v7, %v4015_v47  ;;  %v1445_v50 = vmul.f32 %v4016_v41, %v3668_v7 }
 0x4b1   : > { %2822 = vmatpush3.bf16.msra.mxu0 %v2819_v5  ;;  %v1435_v5 = vmul.f32 %v4006_v9, %v3668_v7  ;;  %v1505_v31 = vmax.f32 %v1473_v54, 0.0  ;;  %v1480_v27 = vadd.f32 %v3670_v11, %v1441_v21  ;;  %v1481_v52 = vadd.f32 %v3670_v11, %v1442_v58 }
 0x4b2   : > { %2824 = vmatprep.subr.bf16.mxu0 %v2823_v39  ;;  %v1482_v53 = vadd.f32 %v3670_v11, %v1443_v56  ;;  %v1483_v3 = vadd.f32 %v3670_v11, %v1444_v33  ;;  %v1484_v38 = vadd.f32 %v3670_v11, %v1445_v50  ;;  %v1517_v17 = vmax.f32 %v3712_v29, 0.0 }
 0x4b3   : > { %v1474_v14 = vadd.f32 %v3670_v11, %v1435_v5  ;;  %v1518_v1 = vmax.f32 %v3715_v57, 0.0  ;;  %v1521_v13 = vmax.f32 %v3743_v2, 0.0  ;;  %v1523_v9 = vmax.f32 %v3751_v4, 0.0  ;;  %v1879_v2 = vld [vmem:[#allocation6] sm:$0x1] }
 0x4b4   : > { %v1514_v26 = vmax.f32 %v1482_v53, 0.0  ;;  %v1516_v34 = vmax.f32 %v1484_v38, 0.0  ;;  %v1524_v29 = vmax.f32 %v3754_v12, 0.0  ;;  %v1525_v57 = vmax.f32 %v3757_v24, 0.0  ;;  %v3834_v4 = vld [vmem:[#allocation4] ss:$0 sm:$0xff] }
 0x4b5   : > { %2826 = vmatpush3.bf16.msra.mxu0 %v2823_v39  ;;  %v4007_v39 = vld [vmem:[#allocation20_spill] sm:$0xff]  ;;  %v1506_v37 = vmax.f32 %v1474_v14, 0.0  ;;  %v3836_v24 = vld [vmem:[#allocation5] ss:$0 sm:$0xff] }
 0x4b6   : > { %2828 = vmatprep.subr.bf16.mxu0 %v2827_v25  ;;  %v1436_v22 = vmul.f32 %v3668_v7, %v4007_v39 }
 0x4b8   : > { %v1475_v32 = vadd.f32 %v3670_v11, %v1436_v22 }
 0x4b9   : > { %2830 = vmatpush3.bf16.msra.mxu0 %v2827_v25  ;;  %v4009_v25 = vld [vmem:[#allocation22_spill] sm:$0xff] }
 0x4ba   : > { %2832 = vmatprep.subr.bf16.mxu0 %v2831_v20  ;;  %v1507_v16 = vmax.f32 %v1475_v32, 0.0 }
 0x4bd   : > { %2834 = vmatpush3.bf16.msra.mxu0 %v2831_v20  ;;  %v1438_v20 = vmul.f32 %v3668_v7, %v4009_v25  ;;  %v1519_v7 = vmax.f32 %v3737_v61, 0.0  ;;  %v1526_v61 = vmax.f32 %v3763_v10, 0.0 }
 0x4bf   : > { %v1477_v8 = vadd.f32 %v3670_v11, %v1438_v20 }
 0x4c0   : > { %2592 = vmatmul.mubr.f32.vlgmr.msra.gmra.mrb[0].mxu0 %v1496_v36  ;;  %v1479_v36 = vadd.f32 %v3670_v11, %v1440_v48  ;;  %v1522_v11 = vmax.f32 %v3748_v6, 0.0  ;;  %v2976_v6 = vmov 0  }
 0x4c1   : > { %2594 = vmatprep.mubr.f32.mxu0 %v1497_v0  ;;  %v1509_v19 = vmax.f32 %v1477_v8, 0.0  ;;  %v1510_v0 = vmax.f32 %v1478_v28, 0.0  ;;  %2921 = vset.pattern.permute.xlu0 %v2976_v6 }
 0x4c2   : > { %1882 = vperm.xlu0 %2921, %v1879_v2  }
 0x4c4   : > { %2595 = vmatmul.mubr.f32.gmra.mrb[2].mxu0 %v1498_v51  ;;  %v1511_v51 = vmax.f32 %v1479_v36, 0.0 }
 0x4c5   : > { %2597 = vmatprep.mubr.f32.mxu0 %v1499_v49  ;;  %v1512_v49 = vmax.f32 %v1480_v27, 0.0 }
 0x4c8   : > { %2598 = vmatmul.mubr.f32.gmra.mrb[4].mxu0 %v1500_v45  ;;  %v1513_v45 = vmax.f32 %v1481_v52, 0.0 }
 0x4c9   : > { %2600 = vmatprep.mubr.f32.mxu0 %v1501_v62  ;;  %v1515_v62 = vmax.f32 %v1483_v3, 0.0 }
 0x4cc   : > { %2601 = vmatmul.mubr.f32.gmra.mrb[6].mxu0 %v1502_v43  ;;  %v1520_v43 = vmax.f32 %v3740_v59, 0.0  ;;  %v3831_v59 = vld [vmem:[%s3949_s4 + $0x2] sm:$0x1] }
 0x4cd   : > { %2603 = vmatprep.mubr.f32.mxu0 %v1503_v44  ;;  %2425 = vmatprep.mubr.f32.mxu1 %v3831_v59 }
 0x4d0   : > { %2604 = vmatmul.mubr.f32.gmra.mrb[8].mxu0 %v1504_v35 }
 0x4d1   : > { %2606 = vmatprep.mubr.f32.mxu0 %v1505_v31 }
 0x4d4   : > { %2607 = vmatmul.mubr.f32.gmra.mrb[10].mxu0 %v1506_v37 }
 0x4d5   : > { %2609 = vmatprep.mubr.f32.mxu0 %v1507_v16 }
 0x4d8   : > { %2610 = vmatmul.mubr.f32.gmra.mrb[12].mxu0 %v1508_v46 }
 0x4d9   : > { %2612 = vmatprep.mubr.f32.mxu0 %v1509_v19 }
 0x4dc   : > { %2613 = vmatmul.mubr.f32.gmra.mrb[14].mxu0 %v1510_v0 }
 0x4dd   : > { %2615 = vmatprep.mubr.f32.mxu0 %v1511_v51 }
 0x4e0   : > { %2616 = vmatmul.mubr.f32.gmra.mrb[16].mxu0 %v1512_v49 }
 0x4e1   : > { %2618 = vmatprep.mubr.f32.mxu0 %v1513_v45 }
 0x4e4   : > { %2619 = vmatmul.mubr.f32.gmra.mrb[18].mxu0 %v1514_v26 }
 0x4e5   : > { %2621 = vmatprep.mubr.f32.mxu0 %v1515_v62 }
 0x4e8   : > { %2622 = vmatmul.mubr.f32.gmra.mrb[20].mxu0 %v1516_v34 }
 0x4e9   : > { %2624 = vmatprep.mubr.f32.mxu0 %v1517_v17 }
 0x4ec   : > { %2625 = vmatmul.mubr.f32.gmra.mrb[22].mxu0 %v1518_v1 }
 0x4ed   : > { %2627 = vmatprep.mubr.f32.mxu0 %v1519_v7 }
 0x4f0   : > { %2628 = vmatmul.mubr.f32.gmra.mrb[24].mxu0 %v1520_v43 }
 0x4f1   : > { %2630 = vmatprep.mubr.f32.mxu0 %v1521_v13 }
 0x4f4   : > { %2631 = vmatmul.mubr.f32.gmra.mrb[26].mxu0 %v1522_v11 }
 0x4f5   : > { %2633 = vmatprep.mubr.f32.mxu0 %v1523_v9 }
 0x4f8   : > { %2634 = vmatmul.mubr.f32.gmra.mrb[28].mxu0 %v1524_v29 }
 0x4f9   : > { %2636 = vmatprep.mubr.f32.mxu0 %v1525_v57 }
 0x4fc   : > { %2637 = vmatmul.mubr.f32.gmra.mrb[30].mxu0 %v1526_v61 }
 0x593   : > { %v2593_v12 = vpop.f32.mrb[0].mxu0 }
 0x594   : > { %v1776_v10 = vmul.f32 %v2593_v12, %v3834_v4  ;;  %v1609_v5 = vpop.f32.mrb[1].mxu0 }
 0x595   : > { %v1775_v44 = vmul.f32 %v3834_v4, %v1609_v5 }
 0x596   : > { %v1815_v54 = vadd.f32 %v3836_v24, %v1776_v10 }
 0x597   : > { %v1814_v39 = vadd.f32 %v3836_v24, %v1775_v44  ;;  %v2596_v22 = vpop.f32.mrb[2].mxu0 }
 0x598   : > { %v1847_v35 = vmax.f32 %v1815_v54, 0.0  ;;  %v1778_v14 = vmul.f32 %v2596_v22, %v3834_v4  ;;  %v1619_v15 = vpop.f32.mrb[3].mxu0 }
 0x599   : > { %v1846_v18 = vmax.f32 %v1814_v39, 0.0  ;;  %v1777_v31 = vmul.f32 %v3834_v4, %v1619_v15 }
 0x59a   : > { %v1817_v32 = vadd.f32 %v3836_v24, %v1778_v14 }
 0x59b   : > { %v1816_v25 = vadd.f32 %v3836_v24, %v1777_v31  ;;  %v2599_v20 = vpop.f32.mrb[4].mxu0  ;;  %v3846_v37 = vpack.c.bf16 %v1847_v35, %v1846_v18 }
 0x59c   : > { %v1849_v40 = vmax.f32 %v1817_v32, 0.0  ;;  %v1780_v42 = vmul.f32 %v2599_v20, %v3834_v4  ;;  %v1629_v55 = vpop.f32.mrb[5].mxu0 }
 0x59d   : > { %v1848_v16 = vmax.f32 %v1816_v25, 0.0  ;;  %v1779_v8 = vmul.f32 %v3834_v4, %v1629_v55 }
 0x59e   : > { %v1819_v23 = vadd.f32 %v3836_v24, %v1780_v42 }
 0x59f   : > { %v1818_v48 = vadd.f32 %v3836_v24, %v1779_v8  ;;  %v2602_v46 = vpop.f32.mrb[6].mxu0  ;;  %v3852_v28 = vpack.c.bf16 %v1849_v40, %v1848_v16 }
 0x5a0   : > { %v1851_v63 = vmax.f32 %v1819_v23, 0.0  ;;  %v1782_v21 = vmul.f32 %v2602_v46, %v3834_v4  ;;  %v1639_v19 = vpop.f32.mrb[7].mxu0 }
 0x5a1   : > { %v1850_v36 = vmax.f32 %v1818_v48, 0.0  ;;  %v1781_v60 = vmul.f32 %v3834_v4, %v1639_v19 }
 0x5a2   : > { %v1821_v58 = vadd.f32 %v3836_v24, %v1782_v21 }
 0x5a3   : > { %v1820_v0 = vadd.f32 %v3836_v24, %v1781_v60  ;;  %v2605_v27 = vpop.f32.mrb[8].mxu0  ;;  %v3858_v30 = vpack.c.bf16 %v1851_v63, %v1850_v36 }
 0x5a4   : > { %v1853_v56 = vmax.f32 %v1821_v58, 0.0  ;;  %v1784_v51 = vmul.f32 %v2605_v27, %v3834_v4  ;;  %v1649_v52 = vpop.f32.mrb[9].mxu0 }
 0x5a5   : > { %v1852_v47 = vmax.f32 %v1820_v0, 0.0  ;;  %v1783_v33 = vmul.f32 %v3834_v4, %v1649_v52 }
 0x5a6   : > { %v1823_v49 = vadd.f32 %v3836_v24, %v1784_v51 }
 0x5a7   : > { %v1822_v53 = vadd.f32 %v3836_v24, %v1783_v33  ;;  %v2608_v41 = vpop.f32.mrb[10].mxu0  ;;  %v3864_v50 = vpack.c.bf16 %v1853_v56, %v1852_v47 }
 0x5a8   : > { %v1855_v45 = vmax.f32 %v1823_v49, 0.0  ;;  %v1786_v3 = vmul.f32 %v2608_v41, %v3834_v4  ;;  %v1659_v26 = vpop.f32.mrb[11].mxu0 }
 0x5a9   : > { %v1854_v38 = vmax.f32 %v1822_v53, 0.0  ;;  %v1785_v62 = vmul.f32 %v3834_v4, %v1659_v26 }
 0x5aa   : > { %v1825_v34 = vadd.f32 %v3836_v24, %v1786_v3 }
 0x5ab   : > { %v1824_v17 = vadd.f32 %v3836_v24, %v1785_v62  ;;  %v2611_v1 = vpop.f32.mrb[12].mxu0  ;;  %v3870_v7 = vpack.c.bf16 %v1855_v45, %v1854_v38 }
 0x5ac   : > { %v1857_v43 = vmax.f32 %v1825_v34, 0.0  ;;  %v1788_v13 = vmul.f32 %v2611_v1, %v3834_v4  ;;  %v1669_v11 = vpop.f32.mrb[13].mxu0 }
 0x5ad   : > { %v1856_v9 = vmax.f32 %v1824_v17, 0.0  ;;  %v1787_v29 = vmul.f32 %v3834_v4, %v1669_v11 }
 0x5ae   : > { %v1827_v57 = vadd.f32 %v3836_v24, %v1788_v13 }
 0x5af   : > { %v1826_v61 = vadd.f32 %v3836_v24, %v1787_v29  ;;  %v2614_v2 = vpop.f32.mrb[14].mxu0  ;;  %v3876_v6 = vpack.c.bf16 %v1857_v43, %v1856_v9 }
 0x5b0   : > { %v1859_v12 = vmax.f32 %v1827_v57, 0.0  ;;  %v1790_v10 = vmul.f32 %v2614_v2, %v3834_v4  ;;  %v1679_v5 = vpop.f32.mrb[15].mxu0 }
 0x5b1   : > { %v1858_v44 = vmax.f32 %v1826_v61, 0.0  ;;  %v1789_v54 = vmul.f32 %v3834_v4, %v1679_v5 }
 0x5b2   : > { %v1829_v39 = vadd.f32 %v3836_v24, %v1790_v10 }
 0x5b3   : > { %v1828_v22 = vadd.f32 %v3836_v24, %v1789_v54  ;;  %v2617_v35 = vpop.f32.mrb[16].mxu0  ;;  %v3882_v14 = vpack.c.bf16 %v1859_v12, %v1858_v44 }
 0x5b4   : > { %v1861_v15 = vmax.f32 %v1829_v39, 0.0  ;;  %v1792_v18 = vmul.f32 %v2617_v35, %v3834_v4  ;;  %v1689_v31 = vpop.f32.mrb[17].mxu0 }
 0x5b5   : > { %v1860_v32 = vmax.f32 %v1828_v22, 0.0  ;;  %v1791_v25 = vmul.f32 %v3834_v4, %v1689_v31 }
 0x5b6   : > { %v1831_v20 = vadd.f32 %v3836_v24, %v1792_v18 }
 0x5b7   : > { %v2620_v40 = vpop.f32.mrb[18].mxu0  ;;  %v1830_v42 = vadd.f32 %v3836_v24, %v1791_v25  ;;  %v3888_v55 = vpack.c.bf16 %v1861_v15, %v1860_v32 }
 0x5b8   : > { %v1794_v16 = vmul.f32 %v2620_v40, %v3834_v4  ;;  %v1699_v8 = vpop.f32.mrb[19].mxu0  ;;  %v1863_v23 = vmax.f32 %v1831_v20, 0.0 }
 0x5b9   : > { %v1793_v48 = vmul.f32 %v3834_v4, %v1699_v8  ;;  %v1862_v46 = vmax.f32 %v1830_v42, 0.0 }
 0x5ba   : > { %v1833_v63 = vadd.f32 %v3836_v24, %v1794_v16 }
 0x5bb   : > { %v1832_v21 = vadd.f32 %v3836_v24, %v1793_v48  ;;  %v2835_v19 = vpack.c.bf16 %v1863_v23, %v1862_v46  ;;  %v2623_v36 = vpop.f32.mrb[20].mxu0 }
 0x5bc   : > { %v1865_v60 = vmax.f32 %v1833_v63, 0.0  ;;  %v1796_v58 = vmul.f32 %v2623_v36, %v3834_v4  ;;  %v1709_v0 = vpop.f32.mrb[21].mxu0 }
 0x5bd   : > { %v1864_v27 = vmax.f32 %v1832_v21, 0.0  ;;  %2836 = vmatprep.subr.bf16.mxu1 %v2835_v19  ;;  %v1795_v56 = vmul.f32 %v3834_v4, %v1709_v0 }
 0x5be   : > { %2838 = vmatpush3.bf16.xpose.msra.mxu1 %v3846_v37  ;;  %v1835_v51 = vadd.f32 %v3836_v24, %v1796_v58  ;;  %v1883_v58 = vpop.permute.xlu0 %1882 }
 0x5bf   : > { %v1834_v52 = vadd.f32 %v3836_v24, %v1795_v56  ;;  %v2839_v47 = vpack.c.bf16 %v1865_v60, %v1864_v27  ;;  %v2626_v33 = vpop.f32.mrb[22].mxu0 }
 0x5c0   : > { %v1867_v49 = vmax.f32 %v1835_v51, 0.0  ;;  %v1798_v53 = vmul.f32 %v2626_v33, %v3834_v4  ;;  %v1719_v41 = vpop.f32.mrb[23].mxu0 }
 0x5c1   : > { %v1866_v45 = vmax.f32 %v1834_v52, 0.0  ;;  %2840 = vmatprep.subr.bf16.mxu1 %v2839_v47  ;;  %v1797_v3 = vmul.f32 %v3834_v4, %v1719_v41 }
 0x5c2   : > { %v1837_v26 = vadd.f32 %v3836_v24, %v1798_v53 }
 0x5c3   : > { %v1836_v38 = vadd.f32 %v3836_v24, %v1797_v3  ;;  %v2843_v62 = vpack.c.bf16 %v1867_v49, %v1866_v45  ;;  %v2629_v37 = vpop.f32.mrb[24].mxu0  ;;  %v2977_v49 = vmov 1966171168  }
 0x5c4   : > { %v1869_v34 = vmax.f32 %v1837_v26, 0.0  ;;  %v1800_v17 = vmul.f32 %v2629_v37, %v3834_v4  ;;  %v1729_v1 = vpop.f32.mrb[25].mxu0  ;;  %v1976_v53 = vunpack.c.l.s4 %v2977_v49 }
 0x5c5   : > { %v1868_v43 = vmax.f32 %v1836_v38, 0.0  ;;  %v1799_v13 = vmul.f32 %v3834_v4, %v1729_v1 }
 0x5c6   : > { %2842 = vmatpush3.bf16.xpose.msra.mxu1 %v3852_v28  ;;  %v1839_v11 = vadd.f32 %v3836_v24, %v1800_v17  ;;  %v1977_v41 = vunpack.c.0.s8 %v1976_v53 }
 0x5c7   : > { %2844 = vmatprep.subr.bf16.mxu1 %v2843_v62  ;;  %v1838_v9 = vadd.f32 %v3836_v24, %v1799_v13  ;;  %v2847_v29 = vpack.c.bf16 %v1869_v34, %v1868_v43  ;;  %v2632_v57 = vpop.f32.mrb[26].mxu0 }
 0x5c8   : > { %v1871_v61 = vmax.f32 %v1839_v11, 0.0  ;;  %v1802_v2 = vmul.f32 %v2632_v57, %v3834_v4  ;;  %v1739_v12 = vpop.f32.mrb[27].mxu0 }
 0x5c9   : > { %v1870_v10 = vmax.f32 %v1838_v9, 0.0  ;;  %v1801_v5 = vmul.f32 %v3834_v4, %v1739_v12 }
 0x5ca   : > { %v1841_v44 = vadd.f32 %v3836_v24, %v1802_v2 }
 0x5cb   : > { %v1840_v54 = vadd.f32 %v3836_v24, %v1801_v5  ;;  %v2851_v39 = vpack.c.bf16 %v1871_v61, %v1870_v10  ;;  %v2635_v28 = vpop.f32.mrb[28].mxu0 }
 0x5cc   : > { %v1873_v22 = vmax.f32 %v1841_v44, 0.0  ;;  %v1804_v35 = vmul.f32 %v2635_v28, %v3834_v4  ;;  %v1749_v15 = vpop.f32.mrb[29].mxu0 }
 0x5cd   : > { %v1872_v18 = vmax.f32 %v1840_v54, 0.0  ;;  %v1803_v31 = vmul.f32 %v3834_v4, %v1749_v15 }
 0x5ce   : > { %2846 = vmatpush3.bf16.xpose.msra.mxu1 %v3858_v30  ;;  %v1843_v32 = vadd.f32 %v3836_v24, %v1804_v35 }
 0x5cf   : > { %2848 = vmatprep.subr.bf16.mxu1 %v2847_v29  ;;  %v1842_v25 = vadd.f32 %v3836_v24, %v1803_v31  ;;  %v2855_v20 = vpack.c.bf16 %v1873_v22, %v1872_v18  ;;  %v2638_v40 = vpop.f32.mrb[30].mxu0 }
 0x5d0   : > { %v1875_v42 = vmax.f32 %v1843_v32, 0.0  ;;  %v1806_v16 = vmul.f32 %v2638_v40, %v3834_v4  ;;  %v1759_v8 = vpop.f32.mrb[31].mxu0 }
 0x5d1   : > { %v1874_v23 = vmax.f32 %v1842_v25, 0.0  ;;  %v1805_v48 = vmul.f32 %v3834_v4, %v1759_v8  ;;  %v4017_v4 = vlaneseq }
 0x5d2   : > { %v1845_v46 = vadd.f32 %v3836_v24, %v1806_v16 }
 0x5d3   : > { %v1844_v63 = vadd.f32 %v3836_v24, %v1805_v48  ;;  %v2859_v21 = vpack.c.bf16 %v1875_v42, %v1874_v23  ;;  %v1886_v24 = vshrl.u32 %v4017_v4, 7  ;;  %vm1992_vm5 = vcmp.lt.s32.totalorder %v4017_v4, 256 }
 0x5d4   : > { %v1877_v30 = vmax.f32 %v1845_v46, 0.0 }
 0x5d5   : > { %v1876_v19 = vmax.f32 %v1844_v63, 0.0  ;;  %v1887_v60 = vsub.s32 0, %v1886_v24  ;;  %v1980_v3 = vsub.s32 %v1977_v41, %v1886_v24 }
 0x5d6   : > { %2850 = vmatpush3.bf16.xpose.msra.mxu1 %v3864_v50 }
 0x5d7   : > { %2852 = vmatprep.subr.bf16.mxu1 %v2851_v39  ;;  %v2863_v36 = vpack.c.bf16 %v1877_v30, %v1876_v19  ;;  %v1888_v50 = vrot.slane %v1883_v58, %v1887_v60 }
 0x5de   : > { %2854 = vmatpush3.bf16.xpose.msra.mxu1 %v3870_v7 }
 0x5df   : > { %2856 = vmatprep.subr.bf16.mxu1 %v2855_v20 }
 0x5e6   : > { %2858 = vmatpush3.bf16.xpose.msra.mxu1 %v3876_v6 }
 0x5e7   : > { %2860 = vmatprep.subr.bf16.mxu1 %v2859_v21 }
 0x5ee   : > { %2862 = vmatpush3.bf16.xpose.msra.mxu1 %v3882_v14 }
 0x5ef   : > { %2864 = vmatprep.subr.bf16.mxu1 %v2863_v36 }
 0x5f6   : > { %2866 = vmatpush3.bf16.xpose.msra.mxu1 %v3888_v55 }
 0x5fd   : > { %2426 = vmatmul.mubr.f32.vlgmr.msra.gmra.mrb[0].mxu1 %v3831_v59 }
 0x6d0   : > { %v1955_v0 = vpop.f32.mrb[0].mxu1 }
 0x6d1   : > { %v1956_v27 = vadd.f32 %v1955_v0, %v1888_v50  ;;  %v1957_v56 = vpop.f32.mrb[1].mxu1 }
 0x6d2   : > { %v1958_v7 = vadd.f32 %v1957_v56, %v1888_v50 }
 0x6d3   : > { %v1960_v51 = vsub.f32 0.0, %v1956_v27 }
 0x6d4   : > { %v1961_v52 = vsub.f32 0.0, %v1958_v7 }
 0x6d5   : > { %v1962_v6 = vmul.f32 1.442695, %v1960_v51 }
 0x6d6   : > { %v1964_v47 = vmul.f32 1.442695, %v1961_v52 }
 0x6d7   : > { %2922 = vpow2.f32 %v1962_v6 }
 0x6d8   : > { %2924 = vpow2.f32 %v1964_v47 }
 0x6e1   : > { %v2923_v14 = vpop.eup %2922 }
 0x6e2   : > { %v2925_v55 = vpop.eup %2924  ;;  %v1966_v33 = vadd.f32 1.0, %v2923_v14 }
 0x6e3   : > { %v1967_v59 = vadd.f32 1.0, %v2925_v55 }
 0x6e4   : > { %2926 = vrcp.f32 %v1966_v33 }
 0x6e5   : > { %2928 = vrcp.f32 %v1967_v59 }
 0x6ee   : > { %v2927_v45 = vpop.eup %2926 }
 0x6ef   : > { %v2929_v26 = vpop.eup %2928 }
 0x6f0   : > { %v1974_v38 = vcombine.low %v2927_v45, %v2929_v26 }
 0x6f2   : > { %v1981_v62 = vrot.slane %v1974_v38, %v1980_v3 }
 0x6f4   : > { %v1988_v37 = vrot.slane %v1981_v62, %v1980_v3 }
 0x6f6   : > { %1994 = vst.msk [vmem:[%s3065_s14] sm:$0x3] %vm1992_vm5, %v1988_v37 }
 0x6f7 PF: > { %s18_s27 = sadd.s32 1, %s2968_s27   ;;  %s4018_s23 = smov %s2960_s25 }
 0x6f8   : > { %p15_p0 = scmp.ge.s32.totalorder %s18_s27, 11   ;;  %s4019_s24 = smov %s2964_s26 }
 0x6f9   : > { %s4020_s25 = smov %s4023_s5  ;;  %s4021_s26 = smov %s4027_s28 }
 0x6fa   :  { %17 = sbr.rel (!%p15_p0) target bundleno = 3 (0x3), region = 102 }

</bundles_post_ra>
